<compile_context>
chip_gen: v7x
topology: tpu7x:2x2x1
jax: 0.10.0
libtpu: 0.0.40
codegen_flags: <defaults>
</compile_context>

<pallas_src>
import math
import functools

import jax
import jax.numpy as jnp
from jax.experimental import pallas as pl
from jax.experimental.pallas import tpu as pltpu

# ----------------------------------------------------------------------------
# pvt_v2_b4 / Net7 configuration (faithful to the PyTorch module)
# ----------------------------------------------------------------------------
EMBED_DIMS = [64, 128, 320, 512]
NUM_HEADS = [1, 2, 5, 8]
MLP_RATIOS = [8, 8, 4, 4]
SR_RATIOS = [8, 4, 2, 1]
DEPTHS = [3, 8, 27, 3]          # real pvt_v2_b4 depths
PATCH_SIZES = [7, 3, 3, 3]
PATCH_STRIDES = [4, 2, 2, 2]
IN_CHANS = 3
DECODER_DIM = 320

IMAGE_RGB_MEAN = [0.485, 0.456, 0.406]
IMAGE_RGB_STD = [0.229, 0.224, 0.225]

# Safe on every generation: v5e/v6e physical VMEM = 128 MiB, v7x = 64 MiB; the actual
# per-call working sets below stay <= ~28 MiB.
_VMEM_LIMIT = 48 * 1024 * 1024


# ----------------------------------------------------------------------------
# tiling helpers
# ----------------------------------------------------------------------------
def _round_up(x, m):
    return ((x + m - 1) // m) * m


def _pick_div(d, cap, gran):
    """Largest tile <= cap that divides d exactly and is a multiple of gran.
    Returns d itself if d <= cap. None if no such divisor exists."""
    if d <= cap:
        return d
    c = (cap // gran) * gran
    while c >= gran:
        if d % c == 0:
            return c
        c -= gran
    return None


def _row_tile(r, cap=512):
    """Row tile for row-parallel elementwise kernels: exact divisor when possible,
    otherwise cap with a cdiv grid (OOB rows in the last block are masked on write)."""
    if r <= cap:
        return r
    t = _pick_div(r, cap, 8)
    return t if t is not None else cap


# ----------------------------------------------------------------------------
# Pallas kernel 1: tiled matmul with fused bias epilogue (all Linear / Conv layers)
#   - bf16 MXU operands, f32 VMEM accumulator, bias added on the last K step,
#     bf16 output (the consumer is always another kernel that re-promotes to f32)
# ----------------------------------------------------------------------------
def _matmul_bias_kernel(a_ref, b_ref, bias_ref, o_ref, acc_ref):
    @pl.when(pl.program_id(2) == 0)
    def _init():
        acc_ref[...] = jnp.zeros_like(acc_ref)

    acc_ref[...] += jnp.dot(a_ref[...].astype(jnp.bfloat16),
                            b_ref[...].astype(jnp.bfloat16),
                            preferred_element_type=jnp.float32)

    @pl.when(pl.program_id(2) == pl.num_programs(2) - 1)
    def _finalize():
        o_ref[...] = (acc_ref[...] + bias_ref[...]).astype(o_ref.dtype)


@functools.partial(jax.jit, static_argnames=("out_dtype",))
def pallas_matmul(a, b, bias=None, out_dtype=jnp.bfloat16):
    """a: (M, K), b: (K, N) -> (M, N) out_dtype; bias (N,) fused into the epilogue."""
    M, K = a.shape
    K2, N = b.shape
    assert K == K2
    if bias is None:
        bias = jnp.zeros((N,), jnp.float32)
    bias2d = bias.astype(jnp.float32).reshape(1, N)

    # K (reduction axis): must tile exactly -> MXU-aligned divisor, full-K block,
    # or zero-pad fallback (never triggered by this model's shapes).
    if K % 128 == 0:
        tk = next(c for c in (512, 256, 128) if K % c == 0)
    elif K <= 4096:
        tk = K
    else:
        Kp = _round_up(K, 128)
        a = jnp.pad(a, ((0, 0), (0, Kp - K)))
        b = jnp.pad(b, ((0, Kp - K), (0, 0)))
        K = Kp
        tk = next(c for c in (512, 256, 128) if K % c == 0)

    # N: 128-aligned divisor, else a single full-width block, else cdiv masked.
    if N % 128 == 0:
        tn = next(c for c in (512, 256, 128) if N % c == 0)
    elif N <= 2048:
        tn = N
    else:
        tn = 512

    # M: exact divisor <= 512 when possible, otherwise cdiv (OOB rows masked on write).
    tm = _pick_div(M, 512, 8) or 512

    grid = (pl.cdiv(M, tm), pl.cdiv(N, tn), K // tk)
    return pl.pallas_call(
        _matmul_bias_kernel,
        out_shape=jax.ShapeDtypeStruct((M, N), out_dtype),
        grid_spec=pltpu.PrefetchScalarGridSpec(
            num_scalar_prefetch=0,
            grid=grid,
            in_specs=[
                pl.BlockSpec((tm, tk), lambda i, j, k: (i, k)),
                pl.BlockSpec((tk, tn), lambda i, j, k: (k, j)),
                pl.BlockSpec((1, tn), lambda i, j, k: (0, j)),
            ],
            out_specs=pl.BlockSpec((tm, tn), lambda i, j, k: (i, j)),
            scratch_shapes=[pltpu.VMEM((tm, tn), jnp.float32)],
        ),
        compiler_params=pltpu.CompilerParams(
            dimension_semantics=("parallel", "parallel", "arbitrary"),
            vmem_limit_bytes=_VMEM_LIMIT),
    )(a, b, bias2d)


# ----------------------------------------------------------------------------
# Pallas kernel 2: fused SRA attention, query-tiled grid over (B*heads, q-blocks)
#   - bf16 q/k/v in, bf16 out, softmax math in f32, EUP reciprocal for the denom
# ----------------------------------------------------------------------------
def _attention_kernel(q_ref, k_ref, v_ref, o_ref, *, scale):
    q = q_ref[0].astype(jnp.bfloat16)                      # (tq, d)
    k = k_ref[0].astype(jnp.bfloat16)                      # (M, d)
    v = v_ref[0].astype(jnp.bfloat16)                      # (M, d)
    s = jax.lax.dot_general(q, k, (((1,), (1,)), ((), ())),
                            preferred_element_type=jnp.float32)
    s = s * scale
    s = s - jnp.max(s, axis=-1, keepdims=True)
    p = jnp.exp(s)
    denom = jnp.sum(p, axis=-1, keepdims=True)
    o = jnp.dot(p.astype(jnp.bfloat16), v, preferred_element_type=jnp.float32)
    o_ref[0] = (o * pl.reciprocal(denom, approx=True)).astype(o_ref.dtype)


@jax.jit
def pallas_attention(q, k, v):
    """q: (G, N, d), k/v: (G, M, d) -> (G, N, d) bf16. KV is post-SR (small), held whole."""
    # TODO(synk): online-softmax (flash) would be needed only if post-SR KV ever got large.
    G, N, d = q.shape
    M = k.shape[1]
    scale = 1.0 / math.sqrt(d)
    tq = _row_tile(N, 512)
    return pl.pallas_call(
        functools.partial(_attention_kernel, scale=scale),
        out_shape=jax.ShapeDtypeStruct((G, N, d), jnp.bfloat16),
        grid=(G, pl.cdiv(N, tq)),
        in_specs=[
            pl.BlockSpec((1, tq, d), lambda g, i: (g, i, 0)),
            pl.BlockSpec((1, M, d), lambda g, i: (g, 0, 0)),
            pl.BlockSpec((1, M, d), lambda g, i: (g, 0, 0)),
        ],
        out_specs=pl.BlockSpec((1, tq, d), lambda g, i: (g, i, 0)),
        compiler_params=pltpu.CompilerParams(
            dimension_semantics=("parallel", "parallel")),
    )(q, k, v)


# ----------------------------------------------------------------------------
# Pallas kernel 3: LayerNorm (normalize over last dim), row-tiled, f32 math, bf16 out
# ----------------------------------------------------------------------------
def _layernorm_kernel(x_ref, g_ref, b_ref, o_ref, *, eps):
    x = x_ref[...].astype(jnp.float32)
    mu = jnp.mean(x, axis=-1, keepdims=True)
    xc = x - mu
    var = jnp.mean(xc * xc, axis=-1, keepdims=True)
    y = xc * jax.lax.rsqrt(var + eps) * g_ref[...] + b_ref[...]
    o_ref[...] = y.astype(o_ref.dtype)


@functools.partial(jax.jit, static_argnames=("eps",))
def pallas_layernorm2d(x2d, gamma, beta, eps):
    R, C = x2d.shape
    tr = _row_tile(R, 512)
    return pl.pallas_call(
        functools.partial(_layernorm_kernel, eps=eps),
        out_shape=jax.ShapeDtypeStruct((R, C), jnp.bfloat16),
        grid=(pl.cdiv(R, tr),),
        in_specs=[
            pl.BlockSpec((tr, C), lambda i: (i, 0)),
            pl.BlockSpec((1, C), lambda i: (0, 0)),
            pl.BlockSpec((1, C), lambda i: (0, 0)),
        ],
        out_specs=pl.BlockSpec((tr, C), lambda i: (i, 0)),
        compiler_params=pltpu.CompilerParams(dimension_semantics=("parallel",)),
    )(x2d, gamma.astype(jnp.float32).reshape(1, C), beta.astype(jnp.float32).reshape(1, C))


# ----------------------------------------------------------------------------
# Pallas kernel 4: per-channel scale+shift+ReLU (BatchNorm apply), row-tiled
# ----------------------------------------------------------------------------
def _scale_shift_relu_kernel(x_ref, s_ref, t_ref, o_ref):
    x = x_ref[...].astype(jnp.float32)
    o_ref[...] = jnp.maximum(x * s_ref[...] + t_ref[...], 0.0).astype(o_ref.dtype)


@jax.jit
def pallas_scale_shift_relu(x2d, scale, shift):
    R, C = x2d.shape
    tr = _row_tile(R, 512)
    return pl.pallas_call(
        _scale_shift_relu_kernel,
        out_shape=jax.ShapeDtypeStruct((R, C), jnp.bfloat16),
        grid=(pl.cdiv(R, tr),),
        in_specs=[
            pl.BlockSpec((tr, C), lambda i: (i, 0)),
            pl.BlockSpec((1, C), lambda i: (0, 0)),
            pl.BlockSpec((1, C), lambda i: (0, 0)),
        ],
        out_specs=pl.BlockSpec((tr, C), lambda i: (i, 0)),
        compiler_params=pltpu.CompilerParams(dimension_semantics=("parallel",)),
    )(x2d, scale.reshape(1, C), shift.reshape(1, C))


# ----------------------------------------------------------------------------
# Pallas kernel 5: depthwise 3x3 conv (stride 1, pad 1), NHWC, with bias + GELU fused
# tiled over (batch, row-blocks-with-halo, channel-blocks); f32 accumulate, bf16 out
# ----------------------------------------------------------------------------
def _dwconv3x3_gelu_kernel(x_ref, w_ref, b_ref, o_ref):
    _, th, W, _ = o_ref.shape
    x = x_ref[0, 0]                     # (th+2, W+2, tc) bf16
    w = w_ref[...]                      # (3, 3, tc) f32
    acc = jnp.zeros(o_ref.shape[1:], jnp.float32)
    for dy in range(3):
        for dx in range(3):
            acc = acc + x[dy:dy + th, dx:dx + W, :] * w[dy, dx, :]
    acc = acc + b_ref[0]
    # TODO(synk): tanh-approximate GELU fused in-kernel; PyTorch nn.GELU default is exact erf.
    c0 = 0.7978845608028654  # sqrt(2/pi)
    g = 0.5 * acc * (1.0 + jnp.tanh(c0 * (acc + 0.044715 * (acc * acc * acc))))
    o_ref[0] = g.astype(o_ref.dtype)


@jax.jit
def pallas_dwconv3x3_gelu(x_nhwc, w, bias):
    B, H, W, C = x_nhwc.shape
    th = _pick_div(H, 32, 1) or H
    nblk = H // th
    tc = _pick_div(C, 256, 128) or C
    ncb = C // tc
    xp = jnp.pad(x_nhwc, ((0, 0), (1, 1), (1, 1), (0, 0)))
    # TODO(synk): halo'd row blocks are still materialized HBM-side (cheap (1+2/th)x bf16
    # copy); a manual-DMA overlapping-window pipeline would remove this copy entirely.
    xhalo = jnp.stack([xp[:, i * th:i * th + th + 2] for i in range(nblk)], axis=1)
    return pl.pallas_call(
        _dwconv3x3_gelu_kernel,
        out_shape=jax.ShapeDtypeStruct((B, H, W, C), jnp.bfloat16),
        grid=(B, nblk, ncb),
        in_specs=[
            pl.BlockSpec((1, 1, th + 2, W + 2, tc), lambda b, i, c: (b, i, 0, 0, c)),
            pl.BlockSpec((3, 3, tc), lambda b, i, c: (0, 0, c)),
            pl.BlockSpec((1, tc), lambda b, i, c: (0, c)),
        ],
        out_specs=pl.BlockSpec((1, th, W, tc), lambda b, i, c: (b, i, 0, c)),
        compiler_params=pltpu.CompilerParams(
            dimension_semantics=("parallel", "parallel", "parallel")),
    )(xhalo, w, bias.reshape(1, C))


# ----------------------------------------------------------------------------
# Pallas kernel 6: direct dense 3x3 conv (stride 1, pad 1), decoder fuse layer.
# Row-tiled with a 1-row halo; 9 MXU taps accumulated in an f32 register block.
# ----------------------------------------------------------------------------
def _conv3x3_kernel(x_ref, w_ref, o_ref):
    th2, W2, Cin = x_ref.shape[2], x_ref.shape[3], x_ref.shape[4]
    th, W = th2 - 2, W2 - 2
    Cout = o_ref.shape[-1]
    x = x_ref[0, 0]                                      # (th+2, W+2, Cin) bf16
    acc = jnp.zeros((th * W, Cout), jnp.float32)
    for dy in range(3):
        for dx in range(3):
            xs = x[dy:dy + th, dx:dx + W, :].reshape(th * W, Cin)
            acc = acc + jnp.dot(xs, w_ref[dy, dx],
                                preferred_element_type=jnp.float32)
    o_ref[0, 0] = acc.astype(o_ref.dtype)


@jax.jit
def pallas_conv3x3(x_nhwc, w):
    """Dense 3x3 / stride 1 / pad 1 conv, bias-free (DAFormer fuse). bf16 in/out."""
    B, H, W, Cin = x_nhwc.shape
    Cout = w.shape[3]
    th = _pick_div(H, 8, 1) or H
    nblk = H // th
    xp = jnp.pad(x_nhwc, ((0, 0), (1, 1), (1, 1), (0, 0)))
    xhalo = jnp.stack([xp[:, i * th:i * th + th + 2] for i in range(nblk)], axis=1)
    y = pl.pallas_call(
        _conv3x3_kernel,
        out_shape=jax.ShapeDtypeStruct((B, nblk, th * W, Cout), jnp.bfloat16),
        grid=(B, nblk),
        in_specs=[
            pl.BlockSpec((1, 1, th + 2, W + 2, Cin), lambda b, i: (b, i, 0, 0, 0)),
            pl.BlockSpec((3, 3, Cin, Cout), lambda b, i: (0, 0, 0, 0)),
        ],
        out_specs=pl.BlockSpec((1, 1, th * W, Cout), lambda b, i: (b, i, 0, 0)),
        compiler_params=pltpu.CompilerParams(
            dimension_semantics=("parallel", "parallel"),
            vmem_limit_bytes=_VMEM_LIMIT),
    )(xhalo, w)
    return y.reshape(B, H, W, Cout)


# ----------------------------------------------------------------------------
# Layer glue (built on the Pallas kernels)
# ----------------------------------------------------------------------------
def linear(x, w, b=None):
    shp = x.shape
    y = pallas_matmul(x.reshape(-1, shp[-1]), w, b)
    return y.reshape(shp[:-1] + (w.shape[1],))


def conv2d(x_nhwc, w, b=None, stride=1, padding=0, dilation=1):
    """w: (kh, kw, cin, cout). 1x1 -> matmul; k==stride -> reshape (no duplication);
    3x3/s1/p1 -> direct Pallas conv; other KxK -> im2col + matmul. Bias fused where possible."""
    kh, kw, cin, cout = w.shape
    B, H, W, C = x_nhwc.shape

    if kh == 1 and kw == 1 and stride == 1 and padding == 0:
        y = pallas_matmul(x_nhwc.reshape(-1, C), w.reshape(cin, cout), b)
        return y.reshape(B, H, W, cout)

    if (kh == kw == stride and padding == 0 and dilation == 1
            and H % stride == 0 and W % stride == 0):
        # non-overlapping patchify (PVTv2 SR conv): pure reshape, no im2col amplification
        s = stride
        Ho, Wo = H // s, W // s
        xp = x_nhwc.reshape(B, Ho, s, Wo, s, C).transpose(0, 1, 3, 2, 4, 5)
        xp = xp.reshape(B, Ho, Wo, s * s * C)
        y = pallas_matmul(xp.reshape(-1, s * s * cin), w.reshape(s * s * cin, cout), b)
        return y.reshape(B, Ho, Wo, cout)

    if kh == kw == 3 and stride == 1 and padding == 1 and dilation == 1:
        y = pallas_conv3x3(x_nhwc, w)
        if b is not None:
            y = y + b
        return y

    # general overlapping KxK (patch embeds): im2col + matmul
    # TODO(synk): patch-embed convs still materialize im2col patches (2.25x for 3x3/s2,
    #             49-tap for the tiny 3-channel stem) - acceptable since inputs are small.
    xp = jnp.pad(x_nhwc, ((0, 0), (padding, padding), (padding, padding), (0, 0)))
    Ho = (H + 2 * padding - dilation * (kh - 1) - 1) // stride + 1
    Wo = (W + 2 * padding - dilation * (kw - 1) - 1) // stride + 1
    cols = []
    for i in range(kh):
        for j in range(kw):
            di, dj = i * dilation, j * dilation
            cols.append(xp[:, di:di + (Ho - 1) * stride + 1:stride,
                           dj:dj + (Wo - 1) * stride + 1:stride, :])
    patches = jnp.concatenate(cols, axis=-1)                 # (B, Ho, Wo, kh*kw*C)
    y = pallas_matmul(patches.reshape(-1, kh * kw * cin),
                      w.reshape(kh * kw * cin, cout), b)
    return y.reshape(B, Ho, Wo, cout)


def layer_norm(x, gamma, beta, eps):
    shp = x.shape
    y = pallas_layernorm2d(x.reshape(-1, shp[-1]), gamma, beta, eps)
    return y.reshape(shp)


@functools.partial(jax.jit, static_argnames=("eps",))
def bn_relu(x_nhwc, gamma, beta, eps=1e-5):
    # TODO(synk): training-mode batch statistics (module default training state).
    B, H, W, C = x_nhwc.shape
    x2 = x_nhwc.reshape(-1, C)
    xf = x2.astype(jnp.float32)
    m1 = jnp.mean(xf, axis=0)
    m2 = jnp.mean(xf * xf, axis=0)            # single fused pass with m1 under jit
    var = m2 - m1 * m1
    scale = gamma * jax.lax.rsqrt(var + eps)
    shift = beta - m1 * scale
    y = pallas_scale_shift_relu(x2, scale, shift)
    return y.reshape(B, H, W, C)


# ----------------------------------------------------------------------------
# PVTv2 encoder
# ----------------------------------------------------------------------------
def attention_fwd(x, H, W, p, num_heads, sr_ratio):
    B, N, C = x.shape
    d = C // num_heads
    if sr_ratio > 1:
        q = linear(x, p["q_w"], p["q_b"])
        x_ = x.reshape(B, H, W, C)
        x_ = conv2d(x_, p["sr_w"], p["sr_b"], stride=sr_ratio, padding=0)
        Hs, Ws = x_.shape[1], x_.shape[2]
        x_ = x_.reshape(B, Hs * Ws, C)
        x_ = layer_norm(x_, p["norm_g"], p["norm_b"], 1e-5)
        kv = linear(x_, p["kv_w"], p["kv_b"])                        # (B, M, 2C)
    else:
        # q and kv share the same input when sr_ratio == 1 -> single fused matmul (N = 3C)
        qkv_w = jnp.concatenate([p["q_w"], p["kv_w"]], axis=1)
        qkv_b = jnp.concatenate([p["q_b"], p["kv_b"]], axis=0)
        qkv = linear(x, qkv_w, qkv_b)                                # (B, N, 3C)
        q, kv = qkv[..., :C], qkv[..., C:]
    q = q.reshape(B, N, num_heads, d).transpose(0, 2, 1, 3)          # (B, h, N, d)
    M = kv.shape[1]
    kv = kv.reshape(B, M, 2, num_heads, d).transpose(2, 0, 3, 1, 4)  # (2, B, h, M, d)
    k, v = kv[0], kv[1]
    o = pallas_attention(q.reshape(B * num_heads, N, d),
                         k.reshape(B * num_heads, M, d),
                         v.reshape(B * num_heads, M, d))
    o = o.reshape(B, num_heads, N, d).transpose(0, 2, 1, 3).reshape(B, N, C)
    return linear(o, p["proj_w"], p["proj_b"])


def mlp_fwd(x, H, W, p):
    B, N, C = x.shape
    h = linear(x, p["fc1_w"], p["fc1_b"])
    hid = h.shape[-1]
    # dwconv bias + GELU fused into the kernel epilogue
    h = pallas_dwconv3x3_gelu(h.reshape(B, H, W, hid), p["dw_w"], p["dw_b"]).reshape(B, N, hid)
    return linear(h, p["fc2_w"], p["fc2_b"])


def block_fwd(x, H, W, p, num_heads, sr_ratio):
    y = layer_norm(x, p["norm1_g"], p["norm1_b"], 1e-6)
    x = x + attention_fwd(y, H, W, p["attn"], num_heads, sr_ratio)
    y = layer_norm(x, p["norm2_g"], p["norm2_b"], 1e-6)
    x = x + mlp_fwd(y, H, W, p["mlp"])
    return x


def patch_embed_fwd(x_nhwc, p, patch_size, stride):
    x = conv2d(x_nhwc, p["proj_w"], p["proj_b"], stride=stride, padding=patch_size // 2)
    B, H, W, E = x.shape
    x = x.reshape(B, H * W, E)
    x = layer_norm(x, p["norm_g"], p["norm_b"], 1e-5)
    return x, H, W


def encoder_fwd(x_nhwc, params):
    outs = []
    cur = x_nhwc
    B = x_nhwc.shape[0]
    for i in range(4):
        sp = params["stages"][i]
        x, H, W = patch_embed_fwd(cur, sp["patch_embed"], PATCH_SIZES[i], PATCH_STRIDES[i])
        for bp in sp["blocks"]:
            x = block_fwd(x, H, W, bp, NUM_HEADS[i], SR_RATIOS[i])
        x = layer_norm(x, sp["norm_g"], sp["norm_b"], 1e-6)
        feat = x.reshape(B, H, W, EMBED_DIMS[i])
        outs.append(feat)
        cur = feat
    return outs


# ----------------------------------------------------------------------------
# DAFormer conv3x3 decoder + heads
# ----------------------------------------------------------------------------
@functools.partial(jax.jit, static_argnames=("s",))
def mix_upsample(x, mixing, s):
    B, H, W, C = x.shape
    bil = jax.image.resize(x, (B, H * s, W * s, C), method="bilinear")
    nrst = jnp.repeat(jnp.repeat(x, s, axis=1), s, axis=2)
    y = mixing * bil.astype(jnp.float32) + (1.0 - mixing) * nrst.astype(jnp.float32)
    return y.astype(x.dtype)


def decoder_fwd(feats, p):
    outs = []
    for i, f in enumerate(feats):
        y = conv2d(f, p["mlp"][i]["conv_w"], None)           # 1x1, bias=False
        y = bn_relu(y, p["mlp"][i]["bn_g"], p["mlp"][i]["bn_b"])
        if i != 0:
            y = mix_upsample(y, p["mlp"][i]["mixing"], 2 ** i)
        outs.append(y)
    x = jnp.concatenate(outs, axis=-1)
    x = pallas_conv3x3(x, p["fuse_w"])                       # 3x3, bias=False, direct MXU conv
    x = bn_relu(x, p["fuse_bn_g"], p["fuse_bn_b"])
    return x, outs


def bce_with_logits(logit, target):
    return jnp.mean(jnp.maximum(logit, 0.0) - logit * target
                    + jnp.log1p(jnp.exp(-jnp.abs(logit))))


def net7_forward(params, batch):
    image = batch["image"]                                    # (B, 3, H, W) NCHW
    mask = batch["mask"]                                      # (B, 1, H, W) NCHW
    mean = jnp.asarray(IMAGE_RGB_MEAN, jnp.float32).reshape(1, 3, 1, 1)
    std = jnp.asarray(IMAGE_RGB_STD, jnp.float32).reshape(1, 3, 1, 1)
    x = (image - mean) / std
    x = jnp.transpose(x, (0, 2, 3, 1)).astype(jnp.bfloat16)   # -> NHWC bf16

    feats = encoder_fwd(x, params["encoder"])
    last, _dec = decoder_fwd(feats, params["decoder"])

    # cout=1 heads stay in plain XLA (1-lane Pallas outputs would be pathological)
    logit = jnp.einsum("bhwc,cn->bhwn", last.astype(jnp.float32),
                       params["logit_w"]) + params["logit_b"]
    B, Hl, Wl, _ = logit.shape
    logit = jax.image.resize(logit, (B, Hl * 4, Wl * 4, 1), method="bilinear")
    logit = jnp.transpose(logit, (0, 3, 1, 2))                      # -> NCHW

    output = {}
    output["bce_loss"] = bce_with_logits(logit, mask)
    for i in range(4):
        aux = jnp.einsum("bhwc,cn->bhwn", feats[i].astype(jnp.float32),
                         params["aux"][i]["w"]) + params["aux"][i]["b"]
        aux = jnp.transpose(aux, (0, 3, 1, 2))                      # (B, 1, Hi, Wi)
        Hi, Wi = aux.shape[-2], aux.shape[-1]
        fh, fw = mask.shape[-2] // Hi, mask.shape[-1] // Wi
        m = mask[:, :, ::fh, ::fw]                                  # PyTorch 'nearest' downsample
        output["aux%d_loss" % i] = bce_with_logits(aux, m)
    output["probability"] = jax.nn.sigmoid(logit)
    return output


# ----------------------------------------------------------------------------
# Deterministic parameter construction (synthetic weights, no checkpoint)
# ----------------------------------------------------------------------------
class KeyGen:
    def __init__(self, seed):
        self._key = jax.random.PRNGKey(seed)

    def __call__(self):
        self._key, k = jax.random.split(self._key)
        return k


def trunc_normal(key, shape, std=0.02, dtype=jnp.bfloat16):
    w = std * jax.random.truncated_normal(key, -2.0, 2.0, shape, jnp.float32)
    return w.astype(dtype)


def conv_init(key, kh, kw, cin, cout, groups=1, dtype=jnp.bfloat16):
    fan_out = kh * kw * cout // groups
    w = jax.random.normal(key, (kh, kw, cin, cout), jnp.float32) * math.sqrt(2.0 / fan_out)
    return w.astype(dtype)


def build_params(seed=0):
    kg = KeyGen(seed)
    stages = []
    in_ch = IN_CHANS
    for i in range(4):
        E = EMBED_DIMS[i]
        ps = PATCH_SIZES[i]
        pe = {
            "proj_w": conv_init(kg(), ps, ps, in_ch, E),
            "proj_b": jnp.zeros((E,), jnp.float32),
            "norm_g": jnp.ones((E,), jnp.float32),
            "norm_b": jnp.zeros((E,), jnp.float32),
        }
        hidden = E * MLP_RATIOS[i]
        sr = SR_RATIOS[i]
        blocks = []
        for _ in range(DEPTHS[i]):
            attn = {
                "q_w": trunc_normal(kg(), (E, E)),
                "q_b": jnp.zeros((E,), jnp.float32),
                "kv_w": trunc_normal(kg(), (E, 2 * E)),
                "kv_b": jnp.zeros((2 * E,), jnp.float32),
                "proj_w": trunc_normal(kg(), (E, E)),
                "proj_b": jnp.zeros((E,), jnp.float32),
            }
            if sr > 1:
                attn["sr_w"] = conv_init(kg(), sr, sr, E, E)
                attn["sr_b"] = jnp.zeros((E,), jnp.float32)
                attn["norm_g"] = jnp.ones((E,), jnp.float32)
                attn["norm_b"] = jnp.zeros((E,), jnp.float32)
            mlp = {
                "fc1_w": trunc_normal(kg(), (E, hidden)),
                "fc1_b": jnp.zeros((hidden,), jnp.float32),
                "dw_w": (jax.random.normal(kg(), (3, 3, hidden), jnp.float32)
                         * math.sqrt(2.0 / 9.0)),
                "dw_b": jnp.zeros((hidden,), jnp.float32),
                "fc2_w": trunc_normal(kg(), (hidden, E)),
                "fc2_b": jnp.zeros((E,), jnp.float32),
            }
            blocks.append({
                "norm1_g": jnp.ones((E,), jnp.float32), "norm1_b": jnp.zeros((E,), jnp.float32),
                "norm2_g": jnp.ones((E,), jnp.float32), "norm2_b": jnp.zeros((E,), jnp.float32),
                "attn": attn, "mlp": mlp,
            })
        stages.append({"patch_embed": pe, "blocks": blocks,
                       "norm_g": jnp.ones((E,), jnp.float32),
                       "norm_b": jnp.zeros((E,), jnp.float32)})
        in_ch = E

    decoder = {
        "mlp": [],
        "fuse_w": conv_init(kg(), 3, 3, 4 * DECODER_DIM, DECODER_DIM),
        "fuse_bn_g": jnp.ones((DECODER_DIM,), jnp.float32),
        "fuse_bn_b": jnp.zeros((DECODER_DIM,), jnp.float32),
    }
    for i in range(4):
        m = {
            "conv_w": conv_init(kg(), 1, 1, EMBED_DIMS[i], DECODER_DIM),
            "bn_g": jnp.ones((DECODER_DIM,), jnp.float32),
            "bn_b": jnp.zeros((DECODER_DIM,), jnp.float32),
        }
        if i != 0:
            m["mixing"] = jnp.float32(0.5)    # MixUpSample learnable mixing, init 0.5
        decoder["mlp"].append(m)

    return {
        "encoder": {"stages": stages},
        "decoder": decoder,
        "logit_w": conv_init(kg(), 1, 1, DECODER_DIM, 1,
                             dtype=jnp.float32).reshape(DECODER_DIM, 1),
        "logit_b": jnp.zeros((1,), jnp.float32),
        "aux": [{"w": conv_init(kg(), 1, 1, EMBED_DIMS[i], 1,
                                dtype=jnp.float32).reshape(EMBED_DIMS[i], 1),
                 "b": jnp.zeros((1,), jnp.float32)} for i in range(4)],
    }


# TODO(synk): dropout / drop-path are identity because the module's defaults are 0.0;
#             BatchNorm uses training-mode batch statistics (module default training state);
#             bf16 weights/activations with f32 accumulation -> tolerance-comparable (not
#             bit-comparable) to an f32 PyTorch run.

if __name__ == "__main__":
    B, H, W = 2, 64, 64
    k_img, k_mask = jax.random.split(jax.random.PRNGKey(0))
    image = jax.random.uniform(k_img, (B, 3, H, W), jnp.float32)
    mask = (jax.random.uniform(k_mask, (B, 1, H, W), jnp.float32) > 0.5).astype(jnp.float32)

    params = build_params(seed=0)
    out = net7_forward(params, {"image": image, "mask": mask})
    out = jax.block_until_ready(out)

    assert out["probability"].shape == (B, 1, H, W)
    for key in ["bce_loss", "aux0_loss", "aux1_loss", "aux2_loss", "aux3_loss"]:
        assert bool(jnp.isfinite(out[key])), key
    assert bool(jnp.all(jnp.isfinite(out["probability"])))
    print("KERNEL_OK")
</pallas_src>

<mosaic_0001>
module attributes {stable_mosaic.version = 11 : i64} {
  func.func @_matmul_bias_kernel(%arg0: i32, %arg1: i32, %arg2: i32, %arg3: memref<512x147xbf16, #tpu.memory_space<vmem>>, %arg4: memref<147x64xbf16, #tpu.memory_space<vmem>>, %arg5: memref<1x64xf32, #tpu.memory_space<vmem>>, %arg6: memref<512x64xbf16, #tpu.memory_space<vmem>>, %arg7: memref<512x64xf32, #tpu.memory_space<vmem>>) attributes {dimension_semantics = [#tpu.dimension_semantics<parallel>, #tpu.dimension_semantics<parallel>, #tpu.dimension_semantics<arbitrary>], iteration_bounds = array<i64: 1, 1, 1>, scalar_prefetch = 0 : i64, scratch_operands = 1 : i64, tpu.core_type = #tpu.core_type<tc>, window_params = [{transform_indices = @transform_0, window_bounds = array<i64: 512, 147>}, {transform_indices = @transform_1, window_bounds = array<i64: 147, 64>}, {transform_indices = @transform_2, window_bounds = array<i64: 1, 64>}, {transform_indices = @transform_3, window_bounds = array<i64: 512, 64>}]} {
    %c0_i32 = arith.constant 0 : i32
    %0 = arith.cmpi eq, %arg2, %c0_i32 : i32
    %1 = arith.extui %0 : i1 to i32
    %c0_i32_0 = arith.constant 0 : i32
    %2 = arith.cmpi ne, %1, %c0_i32_0 : i32
    scf.if %2 {
      %cst_10 = arith.constant 0.000000e+00 : f32
      %12 = vector.broadcast %cst_10 : f32 to vector<512x64xf32>
      %c0_11 = arith.constant 0 : index
      %c0_12 = arith.constant 0 : index
      %13 = vector.load %arg7[%c0_11, %c0_12] : memref<512x64xf32, #tpu.memory_space<vmem>>, vector<512x64xf32>
      tpu.vector_store %arg7[%c0_11, %c0_12], %12 {strides = array<i32>} : memref<512x64xf32, #tpu.memory_space<vmem>>, vector<512x64xf32>,
    } else {
    }
    %c0 = arith.constant 0 : index
    %c0_1 = arith.constant 0 : index
    %3 = vector.load %arg7[%c0, %c0_1] : memref<512x64xf32, #tpu.memory_space<vmem>>, vector<512x64xf32>
    %c0_2 = arith.constant 0 : index
    %c0_3 = arith.constant 0 : index
    %4 = vector.load %arg3[%c0_2, %c0_3] : memref<512x147xbf16, #tpu.memory_space<vmem>>, vector<512x147xbf16>
    %c0_4 = arith.constant 0 : index
    %c0_5 = arith.constant 0 : index
    %5 = vector.load %arg4[%c0_4, %c0_5] : memref<147x64xbf16, #tpu.memory_space<vmem>>, vector<147x64xbf16>
    %cst = arith.constant dense<0.000000e+00> : vector<512x64xf32>
    %6 = tpu.matmul %4, %5, %cst {dimension_numbers = #tpu.dot_dimension_numbers<[1], [0], [0], [1], [0, 0, 1, 1], [], []>} : vector<512x147xbf16>, vector<147x64xbf16>, vector<512x64xf32> -> vector<512x64xf32>
    %7 = arith.addf %3, %6 : vector<512x64xf32>
    %c0_6 = arith.constant 0 : index
    %c0_7 = arith.constant 0 : index
    %8 = vector.load %arg7[%c0_6, %c0_7] : memref<512x64xf32, #tpu.memory_space<vmem>>, vector<512x64xf32>
    tpu.vector_store %arg7[%c0_6, %c0_7], %7 {strides = array<i32>} : memref<512x64xf32, #tpu.memory_space<vmem>>, vector<512x64xf32>,
    %c0_i32_8 = arith.constant 0 : i32
    %9 = arith.cmpi eq, %arg2, %c0_i32_8 : i32
    %10 = arith.extui %9 : i1 to i32
    %c0_i32_9 = arith.constant 0 : i32
    %11 = arith.cmpi ne, %10, %c0_i32_9 : i32
    scf.if %11 {
      %c0_10 = arith.constant 0 : index
      %c0_11 = arith.constant 0 : index
      %12 = vector.load %arg7[%c0_10, %c0_11] : memref<512x64xf32, #tpu.memory_space<vmem>>, vector<512x64xf32>
      %c0_12 = arith.constant 0 : index
      %c0_13 = arith.constant 0 : index
      %13 = vector.load %arg5[%c0_12, %c0_13] : memref<1x64xf32, #tpu.memory_space<vmem>>, vector<1x64xf32>
      %14 = vector.broadcast %13 : vector<1x64xf32> to vector<512x64xf32>
      %15 = arith.addf %12, %14 : vector<512x64xf32>
      %16 = arith.truncf %15 : vector<512x64xf32> to vector<512x64xbf16>
      %c0_14 = arith.constant 0 : index
      %c0_15 = arith.constant 0 : index
      %17 = vector.load %arg6[%c0_14, %c0_15] : memref<512x64xbf16, #tpu.memory_space<vmem>>, vector<512x64xbf16>
      tpu.vector_store %arg6[%c0_14, %c0_15], %16 {strides = array<i32>} : memref<512x64xbf16, #tpu.memory_space<vmem>>, vector<512x64xbf16>,
    } else {
    }
    return
  }
  func.func @transform_0(%arg0: i32, %arg1: i32, %arg2: i32) -> (i32, i32) {
    %c0_i32 = arith.constant 0 : i32
    return %arg0, %arg2 : i32, i32
  }
  func.func @transform_1(%arg0: i32, %arg1: i32, %arg2: i32) -> (i32, i32) {
    %c0_i32 = arith.constant 0 : i32
    return %arg2, %arg1 : i32, i32
  }
  func.func @transform_2(%arg0: i32, %arg1: i32, %arg2: i32) -> (i32, i32) {
    %c0_i32 = arith.constant 0 : i32
    %c0_i32_0 = arith.constant 0 : i32
    return %c0_i32, %arg1 : i32, i32
  }
  func.func @transform_3(%arg0: i32, %arg1: i32, %arg2: i32) -> (i32, i32) {
    %c0_i32 = arith.constant 0 : i32
    return %arg0, %arg1 : i32, i32
  }
}

</mosaic_0001>

<bundles_post_ra>
// kernel: pallas_matmul.1
= control target key start
LH: loop header
LB: loop body
LE: loop exit
PB: predicated region body
PF: predicated region fallthrough
CT: control target
= control target key end

     0   :  { %v1926_v0 = vmov 0   ;;  %vm576_vm0 = vcmask 154624   ;;  %vm673_vm1 = vcmask 1040384   ;;  %vm674_vm2 = vcmask 1041408   ;;  %s2719_s1 = inlined_call_operand.vmem [shape: bf16[147,64], index: 1, kind: input, shape index: {}]   ;;  %s2720_s0 = inlined_call_operand.vmem [shape: bf16[512,147], index: 0, kind: input, shape index: {}]   ;;  %s2721_s2 = inlined_call_operand.vmem [shape: f32[1,64], index: 2, kind: input, shape index: {}]   ;;  %s2722_s3 = inlined_call_operand.vmem [shape: bf16[512,64], index: 3, kind: output, shape index: {}]  }
   0x1   :  { %680 = vmatprep.subr.bf16.mxu0 %v1926_v0  ;;  %1796 = vmatprep.subr.bf16.mxu1 %v1926_v0  ;;  %v1819_v1 = vld [vmem:[%s2719_s1] sm:$0xff]   ;;  %v1820_v2 = vld [vmem:[%s2719_s1 + $0x8] sm:$0xff]   ;;  %v1821_v3 = vld [vmem:[%s2719_s1 + $0x10] sm:$0xff]   ;;  %v1927_v11 = vmov 65535   ;;  %vm19_vm3 = vcmask 523264   ;;  %v1928_v17 = vmov 0.0  }
   0x2   :  { %681 = vmatpush1.bf16.msra.mxu0 %v1819_v1  ;;  %1806 = vmatpush1.bf16.msra.mxu1 %v1819_v1  ;;  %v1822_v4 = vld [vmem:[%s2719_s1 + $0x18] sm:$0xff]   ;;  %v1831_v5 = vld [vmem:[%s2720_s0 + $0x4] ss:$8 sps:$4 sm:$0xff]   ;;  %v1825_v9 = vld [vmem:[%s2719_s1 + $0x30] sm:$0xff]   ;;  %v675_v12 = vsel %vm673_vm1, 4294967295, %v1927_v11  ;;  %20 = vst.msk [vmem:[#allocation2] sm:$0xff] %vm19_vm3, %v1928_v17 }
   0x3   :  { %682 = vmatprep.subr.bf16.mxu0 %v1926_v0  ;;  %1797 = vmatprep.subr.bf16.mxu1 %v1926_v0  ;;  %v1834_v6 = vld [vmem:[%s2720_s0 + $0x104] ss:$8 sps:$4 sm:$0xff]   ;;  %v1826_v10 = vld [vmem:[%s2719_s1 + $0x38] sm:$0xff]   ;;  %v1828_v14 = vld [vmem:[%s2719_s1 + $0x48] ss:$0 sps:$4 sm:$0x33]  }
   0x4   :  { %1635 = vmatprep.mubr.msk.bf16.mxu0 %vm576_vm0, %v1831_v5  ;;  %v1823_v7 = vld [vmem:[%s2719_s1 + $0x20] sm:$0xff]   ;;  %1651 = vmatprep.mubr.msk.bf16.mxu1 %vm576_vm0, %v1834_v6  ;;  %v1824_v8 = vld [vmem:[%s2719_s1 + $0x28] sm:$0xff]   ;;  %v676_v15 = vsel %vm674_vm2, %v675_v12, 0  ;;  %21 = vst.msk [vmem:[#allocation2 + $0x8] sm:$0xff] %vm19_vm3, %v1928_v17  ;;  %22 = vst.msk [vmem:[#allocation2 + $0x10] sm:$0xff] %vm19_vm3, %v1928_v17  ;;  %vm1492_vm4 = vcmask 519168  }
   0x5   :  { %v1827_v13 = vld [vmem:[%s2719_s1 + $0x40] sm:$0xff]   ;;  %v1987_v16 = vand.u32 %v1828_v14, %v676_v15  ;;  %23 = vst.msk [vmem:[#allocation2 + $0x18] sm:$0xff] %vm19_vm3, %v1928_v17  ;;  %24 = vst.msk [vmem:[#allocation2 + $0x20] sm:$0xff] %vm19_vm3, %v1928_v17  ;;  %v1835_v20 = vld [vmem:[%s2720_s0 + $0x14] ss:$8 sps:$4 sm:$0xff]  }
   0x6   :  { %683 = vmatpush1.bf16.msra.mxu0 %v1820_v2  ;;  %1807 = vmatpush1.bf16.msra.mxu1 %v1820_v2  ;;  %25 = vst.msk [vmem:[#allocation2 + $0x28] sm:$0xff] %vm19_vm3, %v1928_v17  ;;  %26 = vst.msk [vmem:[#allocation2 + $0x30] sm:$0xff] %vm19_vm3, %v1928_v17  ;;  %v1829_v18 = vld [vmem:[%s2720_s0] ss:$8 sps:$4 sm:$0xff]   ;;  %v1837_v21 = vld [vmem:[%s2720_s0 + $0x114] ss:$8 sps:$4 sm:$0xff]  }
   0x7   :  { %684 = vmatprep.subr.bf16.mxu0 %v1926_v0  ;;  %1798 = vmatprep.subr.bf16.mxu1 %v1926_v0  ;;  %27 = vst.msk [vmem:[#allocation2 + $0x38] sm:$0xff] %vm19_vm3, %v1928_v17  ;;  %28 = vst.msk [vmem:[#allocation2 + $0x40] sm:$0xff] %vm19_vm3, %v1928_v17  ;;  %v1832_v19 = vld [vmem:[%s2720_s0 + $0x100] ss:$8 sps:$4 sm:$0xff]   ;;  %v1839_v22 = vld [vmem:[%s2720_s0 + $0x10] ss:$8 sps:$4 sm:$0xff]  }
   0x8   :  { %29 = vst.msk [vmem:[#allocation2 + $0x48] sm:$0xff] %vm19_vm3, %v1928_v17  ;;  %30 = vst.msk [vmem:[#allocation2 + $0x50] sm:$0xff] %vm19_vm3, %v1928_v17  ;;  %v1840_v23 = vld [vmem:[%s2720_s0 + $0x110] ss:$8 sps:$4 sm:$0xff]   ;;  %v1841_v24 = vld [vmem:[%s2720_s0 + $0x24] ss:$8 sps:$4 sm:$0xff]  }
   0x9   :  { %31 = vst.msk [vmem:[#allocation2 + $0x58] sm:$0xff] %vm19_vm3, %v1928_v17  ;;  %32 = vst.msk [vmem:[#allocation2 + $0x60] sm:$0xff] %vm19_vm3, %v1928_v17  ;;  %v1843_v25 = vld [vmem:[%s2720_s0 + $0x124] ss:$8 sps:$4 sm:$0xff]   ;;  %v1845_v26 = vld [vmem:[%s2720_s0 + $0x20] ss:$8 sps:$4 sm:$0xff]  }
   0xa   :  { %685 = vmatpush1.bf16.msra.mxu0 %v1821_v3  ;;  %1808 = vmatpush1.bf16.msra.mxu1 %v1821_v3  ;;  %33 = vst.msk [vmem:[#allocation2 + $0x68] sm:$0xff] %vm19_vm3, %v1928_v17  ;;  %34 = vst.msk [vmem:[#allocation2 + $0x70] sm:$0xff] %vm19_vm3, %v1928_v17  ;;  %v1846_v27 = vld [vmem:[%s2720_s0 + $0x120] ss:$8 sps:$4 sm:$0xff]   ;;  %v1847_v28 = vld [vmem:[%s2720_s0 + $0x34] ss:$8 sps:$4 sm:$0xff]  }
   0xb   :  { %686 = vmatprep.subr.bf16.mxu0 %v1926_v0  ;;  %1799 = vmatprep.subr.bf16.mxu1 %v1926_v0  ;;  %35 = vst.msk [vmem:[#allocation2 + $0x78] sm:$0xff] %vm19_vm3, %v1928_v17  ;;  %36 = vst.msk [vmem:[#allocation2 + $0x80] sm:$0xff] %vm19_vm3, %v1928_v17  ;;  %v1849_v29 = vld [vmem:[%s2720_s0 + $0x134] ss:$8 sps:$4 sm:$0xff]   ;;  %v1851_v30 = vld [vmem:[%s2720_s0 + $0x30] ss:$8 sps:$4 sm:$0xff]  }
   0xc   :  { %37 = vst.msk [vmem:[#allocation2 + $0x88] sm:$0xff] %vm19_vm3, %v1928_v17  ;;  %38 = vst.msk [vmem:[#allocation2 + $0x90] sm:$0xff] %vm19_vm3, %v1928_v17  ;;  %v1852_v31 = vld [vmem:[%s2720_s0 + $0x130] ss:$8 sps:$4 sm:$0xff]   ;;  %v1853_v32 = vld [vmem:[%s2720_s0 + $0x44] ss:$8 sps:$4 sm:$0xff]  }
   0xd   :  { %39 = vst.msk [vmem:[#allocation2 + $0x98] sm:$0xff] %vm19_vm3, %v1928_v17  ;;  %40 = vst.msk [vmem:[#allocation2 + $0xa0] sm:$0xff] %vm19_vm3, %v1928_v17  ;;  %v1855_v33 = vld [vmem:[%s2720_s0 + $0x144] ss:$8 sps:$4 sm:$0xff]   ;;  %v1857_v34 = vld [vmem:[%s2720_s0 + $0x40] ss:$8 sps:$4 sm:$0xff]  }
   0xe   :  { %687 = vmatpush1.bf16.msra.mxu0 %v1822_v4  ;;  %1809 = vmatpush1.bf16.msra.mxu1 %v1822_v4  ;;  %41 = vst.msk [vmem:[#allocation2 + $0xa8] sm:$0xff] %vm19_vm3, %v1928_v17  ;;  %42 = vst.msk [vmem:[#allocation2 + $0xb0] sm:$0xff] %vm19_vm3, %v1928_v17  ;;  %v1858_v35 = vld [vmem:[%s2720_s0 + $0x140] ss:$8 sps:$4 sm:$0xff]   ;;  %v1859_v36 = vld [vmem:[%s2720_s0 + $0x54] ss:$8 sps:$4 sm:$0xff]  }
   0xf   :  { %688 = vmatprep.subr.bf16.mxu0 %v1926_v0  ;;  %1800 = vmatprep.subr.bf16.mxu1 %v1926_v0  ;;  %43 = vst.msk [vmem:[#allocation2 + $0xb8] sm:$0xff] %vm19_vm3, %v1928_v17  ;;  %44 = vst.msk [vmem:[#allocation2 + $0xc0] sm:$0xff] %vm19_vm3, %v1928_v17  ;;  %v1861_v37 = vld [vmem:[%s2720_s0 + $0x154] ss:$8 sps:$4 sm:$0xff]   ;;  %v1863_v38 = vld [vmem:[%s2720_s0 + $0x50] ss:$8 sps:$4 sm:$0xff]  }
  0x10   :  { %45 = vst.msk [vmem:[#allocation2 + $0xc8] sm:$0xff] %vm19_vm3, %v1928_v17  ;;  %46 = vst.msk [vmem:[#allocation2 + $0xd0] sm:$0xff] %vm19_vm3, %v1928_v17  ;;  %v1864_v39 = vld [vmem:[%s2720_s0 + $0x150] ss:$8 sps:$4 sm:$0xff]   ;;  %v1865_v40 = vld [vmem:[%s2720_s0 + $0x64] ss:$8 sps:$4 sm:$0xff]  }
  0x11   :  { %47 = vst.msk [vmem:[#allocation2 + $0xd8] sm:$0xff] %vm19_vm3, %v1928_v17  ;;  %48 = vst.msk [vmem:[#allocation2 + $0xe0] sm:$0xff] %vm19_vm3, %v1928_v17  ;;  %v1867_v41 = vld [vmem:[%s2720_s0 + $0x164] ss:$8 sps:$4 sm:$0xff]   ;;  %v1869_v42 = vld [vmem:[%s2720_s0 + $0x60] ss:$8 sps:$4 sm:$0xff]  }
  0x12   :  { %689 = vmatpush1.bf16.msra.mxu0 %v1823_v7  ;;  %1810 = vmatpush1.bf16.msra.mxu1 %v1823_v7  ;;  %49 = vst.msk [vmem:[#allocation2 + $0xe8] sm:$0xff] %vm19_vm3, %v1928_v17  ;;  %50 = vst.msk [vmem:[#allocation2 + $0xf0] sm:$0xff] %vm19_vm3, %v1928_v17  ;;  %v1870_v43 = vld [vmem:[%s2720_s0 + $0x160] ss:$8 sps:$4 sm:$0xff]   ;;  %v1871_v44 = vld [vmem:[%s2720_s0 + $0x74] ss:$8 sps:$4 sm:$0xff]  }
  0x13   :  { %690 = vmatprep.subr.bf16.mxu0 %v1926_v0  ;;  %1801 = vmatprep.subr.bf16.mxu1 %v1926_v0  ;;  %51 = vst.msk [vmem:[#allocation2 + $0xf8] sm:$0xff] %vm19_vm3, %v1928_v17  ;;  %52 = vst.msk [vmem:[#allocation2 + $0x100] sm:$0xff] %vm19_vm3, %v1928_v17  ;;  %v1873_v45 = vld [vmem:[%s2720_s0 + $0x174] ss:$8 sps:$4 sm:$0xff]   ;;  %v1875_v46 = vld [vmem:[%s2720_s0 + $0x70] ss:$8 sps:$4 sm:$0xff]  }
  0x14   :  { %53 = vst.msk [vmem:[#allocation2 + $0x108] sm:$0xff] %vm19_vm3, %v1928_v17  ;;  %54 = vst.msk [vmem:[#allocation2 + $0x110] sm:$0xff] %vm19_vm3, %v1928_v17  ;;  %v1876_v47 = vld [vmem:[%s2720_s0 + $0x170] ss:$8 sps:$4 sm:$0xff]   ;;  %v1877_v48 = vld [vmem:[%s2720_s0 + $0x84] ss:$8 sps:$4 sm:$0xff]  }
  0x15   :  { %55 = vst.msk [vmem:[#allocation2 + $0x118] sm:$0xff] %vm19_vm3, %v1928_v17  ;;  %56 = vst.msk [vmem:[#allocation2 + $0x120] sm:$0xff] %vm19_vm3, %v1928_v17  ;;  %v1879_v49 = vld [vmem:[%s2720_s0 + $0x184] ss:$8 sps:$4 sm:$0xff]   ;;  %v1881_v50 = vld [vmem:[%s2720_s0 + $0x80] ss:$8 sps:$4 sm:$0xff]  }
  0x16   :  { %691 = vmatpush1.bf16.msra.mxu0 %v1824_v8  ;;  %1811 = vmatpush1.bf16.msra.mxu1 %v1824_v8  ;;  %57 = vst.msk [vmem:[#allocation2 + $0x128] sm:$0xff] %vm19_vm3, %v1928_v17  ;;  %58 = vst.msk [vmem:[#allocation2 + $0x130] sm:$0xff] %vm19_vm3, %v1928_v17  ;;  %v1882_v51 = vld [vmem:[%s2720_s0 + $0x180] ss:$8 sps:$4 sm:$0xff]   ;;  %v1883_v52 = vld [vmem:[%s2720_s0 + $0x94] ss:$8 sps:$4 sm:$0xff]  }
  0x17   :  { %692 = vmatprep.subr.bf16.mxu0 %v1926_v0  ;;  %1802 = vmatprep.subr.bf16.mxu1 %v1926_v0  ;;  %59 = vst.msk [vmem:[#allocation2 + $0x138] sm:$0xff] %vm19_vm3, %v1928_v17  ;;  %60 = vst.msk [vmem:[#allocation2 + $0x140] sm:$0xff] %vm19_vm3, %v1928_v17  ;;  %v1885_v53 = vld [vmem:[%s2720_s0 + $0x194] ss:$8 sps:$4 sm:$0xff]   ;;  %v1887_v54 = vld [vmem:[%s2720_s0 + $0x90] ss:$8 sps:$4 sm:$0xff]  }
  0x18   :  { %61 = vst.msk [vmem:[#allocation2 + $0x148] sm:$0xff] %vm19_vm3, %v1928_v17  ;;  %62 = vst.msk [vmem:[#allocation2 + $0x150] sm:$0xff] %vm19_vm3, %v1928_v17  ;;  %v1888_v55 = vld [vmem:[%s2720_s0 + $0x190] ss:$8 sps:$4 sm:$0xff]   ;;  %v1889_v56 = vld [vmem:[%s2720_s0 + $0xa4] ss:$8 sps:$4 sm:$0xff]  }
  0x19   :  { %63 = vst.msk [vmem:[#allocation2 + $0x158] sm:$0xff] %vm19_vm3, %v1928_v17  ;;  %64 = vst.msk [vmem:[#allocation2 + $0x160] sm:$0xff] %vm19_vm3, %v1928_v17  ;;  %v1891_v57 = vld [vmem:[%s2720_s0 + $0x1a4] ss:$8 sps:$4 sm:$0xff]   ;;  %v1893_v58 = vld [vmem:[%s2720_s0 + $0xa0] ss:$8 sps:$4 sm:$0xff]  }
  0x1a   :  { %693 = vmatpush1.bf16.msra.mxu0 %v1825_v9  ;;  %1812 = vmatpush1.bf16.msra.mxu1 %v1825_v9  ;;  %65 = vst.msk [vmem:[#allocation2 + $0x168] sm:$0xff] %vm19_vm3, %v1928_v17  ;;  %66 = vst.msk [vmem:[#allocation2 + $0x170] sm:$0xff] %vm19_vm3, %v1928_v17  ;;  %v1894_v59 = vld [vmem:[%s2720_s0 + $0x1a0] ss:$8 sps:$4 sm:$0xff]   ;;  %v1895_v60 = vld [vmem:[%s2720_s0 + $0xb4] ss:$8 sps:$4 sm:$0xff]  }
  0x1b   :  { %694 = vmatprep.subr.bf16.mxu0 %v1926_v0  ;;  %1803 = vmatprep.subr.bf16.mxu1 %v1926_v0  ;;  %67 = vst.msk [vmem:[#allocation2 + $0x178] sm:$0xff] %vm19_vm3, %v1928_v17  ;;  %68 = vst.msk [vmem:[#allocation2 + $0x180] sm:$0xff] %vm19_vm3, %v1928_v17  ;;  %v1897_v61 = vld [vmem:[%s2720_s0 + $0x1b4] ss:$8 sps:$4 sm:$0xff]   ;;  %v1899_v62 = vld [vmem:[%s2720_s0 + $0xb0] ss:$8 sps:$4 sm:$0xff]  }
  0x1c   :  { %69 = vst.msk [vmem:[#allocation2 + $0x188] sm:$0xff] %vm19_vm3, %v1928_v17  ;;  %70 = vst.msk [vmem:[#allocation2 + $0x190] sm:$0xff] %vm19_vm3, %v1928_v17  ;;  %v1900_v63 = vld [vmem:[%s2720_s0 + $0x1b0] ss:$8 sps:$4 sm:$0xff]   ;;  %v1903_v1 = vld [vmem:[%s2720_s0 + $0x1c4] ss:$8 sps:$4 sm:$0xff]  }
  0x1d   :  { %71 = vst.msk [vmem:[#allocation2 + $0x198] sm:$0xff] %vm19_vm3, %v1928_v17  ;;  %72 = vst.msk [vmem:[#allocation2 + $0x1a0] sm:$0xff] %vm19_vm3, %v1928_v17  ;;  %v1905_v2 = vld [vmem:[%s2720_s0 + $0xc0] ss:$8 sps:$4 sm:$0xff]   ;;  %v1907_v4 = vld [vmem:[%s2720_s0 + $0xd4] ss:$8 sps:$4 sm:$0xff]  }
  0x1e   :  { %695 = vmatpush1.bf16.msra.mxu0 %v1826_v10  ;;  %1813 = vmatpush1.bf16.msra.mxu1 %v1826_v10  ;;  %73 = vst.msk [vmem:[#allocation2 + $0x1a8] sm:$0xff] %vm19_vm3, %v1928_v17  ;;  %74 = vst.msk [vmem:[#allocation2 + $0x1b0] sm:$0xff] %vm19_vm3, %v1928_v17  ;;  %v1906_v3 = vld [vmem:[%s2720_s0 + $0x1c0] ss:$8 sps:$4 sm:$0xff]   ;;  %v1909_v5 = vld [vmem:[%s2720_s0 + $0x1d4] ss:$8 sps:$4 sm:$0xff]  }
  0x1f   :  { %696 = vmatprep.subr.bf16.mxu0 %v1926_v0  ;;  %1804 = vmatprep.subr.bf16.mxu1 %v1926_v0  ;;  %75 = vst.msk [vmem:[#allocation2 + $0x1b8] sm:$0xff] %vm19_vm3, %v1928_v17  ;;  %76 = vst.msk [vmem:[#allocation2 + $0x1c0] sm:$0xff] %vm19_vm3, %v1928_v17  ;;  %v1911_v6 = vld [vmem:[%s2720_s0 + $0xd0] ss:$8 sps:$4 sm:$0xff]   ;;  %v1913_v8 = vld [vmem:[%s2720_s0 + $0xe4] ss:$8 sps:$4 sm:$0xff]  }
  0x20   :  { %77 = vst.msk [vmem:[#allocation2 + $0x1c8] sm:$0xff] %vm19_vm3, %v1928_v17  ;;  %78 = vst.msk [vmem:[#allocation2 + $0x1d0] sm:$0xff] %vm19_vm3, %v1928_v17  ;;  %v1912_v7 = vld [vmem:[%s2720_s0 + $0x1d0] ss:$8 sps:$4 sm:$0xff]   ;;  %v1915_v9 = vld [vmem:[%s2720_s0 + $0x1e4] ss:$8 sps:$4 sm:$0xff]  }
  0x21   :  { %79 = vst.msk [vmem:[#allocation2 + $0x1d8] sm:$0xff] %vm19_vm3, %v1928_v17  ;;  %80 = vst.msk [vmem:[#allocation2 + $0x1e0] sm:$0xff] %vm19_vm3, %v1928_v17  ;;  %v1917_v10 = vld [vmem:[%s2720_s0 + $0xe0] ss:$8 sps:$4 sm:$0xff]   ;;  %v1919_v12 = vld [vmem:[%s2720_s0 + $0xf4] ss:$8 sps:$4 sm:$0xff]  }
  0x22   :  { %697 = vmatpush1.bf16.msra.mxu0 %v1827_v13  ;;  %1814 = vmatpush1.bf16.msra.mxu1 %v1827_v13  ;;  %81 = vst.msk [vmem:[#allocation2 + $0x1e8] sm:$0xff] %vm19_vm3, %v1928_v17  ;;  %82 = vst.msk [vmem:[#allocation2 + $0x1f0] sm:$0xff] %vm19_vm3, %v1928_v17  ;;  %v1918_v11 = vld [vmem:[%s2720_s0 + $0x1e0] ss:$8 sps:$4 sm:$0xff]   ;;  %v1921_v13 = vld [vmem:[%s2720_s0 + $0x1f4] ss:$8 sps:$4 sm:$0xff]  }
  0x23   :  { %698 = vmatprep.subr.bf16.mxu0 %v1926_v0  ;;  %1805 = vmatprep.subr.bf16.mxu1 %v1926_v0  ;;  %83 = vst.msk [vmem:[#allocation2 + $0x1f8] sm:$0xff] %vm19_vm3, %v1928_v17  ;;  %v1901_v0 = vld [vmem:[%s2720_s0 + $0xc4] ss:$8 sps:$4 sm:$0xff]   ;;  %v1923_v14 = vld [vmem:[%s2720_s0 + $0xf0] ss:$8 sps:$4 sm:$0xff]  }
  0x24   :  { %v1924_v15 = vld [vmem:[%s2720_s0 + $0x1f0] ss:$8 sps:$4 sm:$0xff]   ;;  %v116_v17 = vld [vmem:[#allocation2 + $0x100] sm:$0xff] }
  0x26   :  { %699 = vmatpush1.bf16.msra.mxu0 %v1987_v16  ;;  %1815 = vmatpush1.bf16.msra.mxu1 %v1987_v16  ;;  %v84_v16 = vld [vmem:[#allocation2] sm:$0xff] }
  0x29   :  { %713 = vmatmul.mubr.bf16.vlgmr.msra.gmra.mrb[0].mxu0 %v1829_v18  ;;  %841 = vmatmul.mubr.bf16.vlgmr.msra.gmra.mrb[0].mxu1 %v1832_v19 }
  0x2a   :  { %1636 = vmatprep.mubr.msk.bf16.mxu0 %vm576_vm0, %v1835_v20  ;;  %1652 = vmatprep.mubr.msk.bf16.mxu1 %vm576_vm0, %v1837_v21  ;;  %v85_v20 = vld [vmem:[#allocation2 + $0x8] sm:$0xff] }
  0x2b   :  { %v117_v21 = vld [vmem:[#allocation2 + $0x108] sm:$0xff] }
  0x31   :  { %721 = vmatmul.mubr.bf16.gmra.mrb[4].mxu0 %v1839_v22  ;;  %849 = vmatmul.mubr.bf16.gmra.mrb[4].mxu1 %v1840_v23 }
  0x32   :  { %1637 = vmatprep.mubr.msk.bf16.mxu0 %vm576_vm0, %v1841_v24  ;;  %1653 = vmatprep.mubr.msk.bf16.mxu1 %vm576_vm0, %v1843_v25 }
  0x39   :  { %729 = vmatmul.mubr.bf16.gmra.mrb[8].mxu0 %v1845_v26  ;;  %857 = vmatmul.mubr.bf16.gmra.mrb[8].mxu1 %v1846_v27 }
  0x3a   :  { %1638 = vmatprep.mubr.msk.bf16.mxu0 %vm576_vm0, %v1847_v28  ;;  %1654 = vmatprep.mubr.msk.bf16.mxu1 %vm576_vm0, %v1849_v29 }
  0x41   :  { %737 = vmatmul.mubr.bf16.gmra.mrb[12].mxu0 %v1851_v30  ;;  %865 = vmatmul.mubr.bf16.gmra.mrb[12].mxu1 %v1852_v31 }
  0x42   :  { %1639 = vmatprep.mubr.msk.bf16.mxu0 %vm576_vm0, %v1853_v32  ;;  %1655 = vmatprep.mubr.msk.bf16.mxu1 %vm576_vm0, %v1855_v33  ;;  %v86_v32 = vld [vmem:[#allocation2 + $0x10] sm:$0xff] }
  0x43   :  { %v118_v33 = vld [vmem:[#allocation2 + $0x110] sm:$0xff] }
  0x49   :  { %745 = vmatmul.mubr.bf16.gmra.mrb[16].mxu0 %v1857_v34  ;;  %873 = vmatmul.mubr.bf16.gmra.mrb[16].mxu1 %v1858_v35  ;;  %v2342_v34 = vld [vmem:[%s2721_s2] ss:$0 sm:$0xff] }
  0x4a   :  { %1640 = vmatprep.mubr.msk.bf16.mxu0 %vm576_vm0, %v1859_v36  ;;  %1656 = vmatprep.mubr.msk.bf16.mxu1 %vm576_vm0, %v1861_v37  ;;  %v87_v37 = vld [vmem:[#allocation2 + $0x18] sm:$0xff] }
  0x51   :  { %753 = vmatmul.mubr.bf16.gmra.mrb[20].mxu0 %v1863_v38  ;;  %881 = vmatmul.mubr.bf16.gmra.mrb[20].mxu1 %v1864_v39  ;;  %v119_v38 = vld [vmem:[#allocation2 + $0x118] sm:$0xff] }
  0x52   :  { %1641 = vmatprep.mubr.msk.bf16.mxu0 %vm576_vm0, %v1865_v40  ;;  %1657 = vmatprep.mubr.msk.bf16.mxu1 %vm576_vm0, %v1867_v41 }
  0x59   :  { %761 = vmatmul.mubr.bf16.gmra.mrb[24].mxu0 %v1869_v42  ;;  %889 = vmatmul.mubr.bf16.gmra.mrb[24].mxu1 %v1870_v43 }
  0x5a   :  { %1642 = vmatprep.mubr.msk.bf16.mxu0 %vm576_vm0, %v1871_v44  ;;  %1658 = vmatprep.mubr.msk.bf16.mxu1 %vm576_vm0, %v1873_v45 }
  0x61   :  { %769 = vmatmul.mubr.bf16.gmra.mrb[28].mxu0 %v1875_v46  ;;  %897 = vmatmul.mubr.bf16.gmra.mrb[28].mxu1 %v1876_v47 }
  0x62   :  { %1643 = vmatprep.mubr.msk.bf16.mxu0 %vm576_vm0, %v1877_v48  ;;  %1659 = vmatprep.mubr.msk.bf16.mxu1 %vm576_vm0, %v1879_v49 }
  0x69   :  { %777 = vmatmul.mubr.bf16.gmra.mrb[32].mxu0 %v1881_v50  ;;  %905 = vmatmul.mubr.bf16.gmra.mrb[32].mxu1 %v1882_v51 }
  0x6a   :  { %1644 = vmatprep.mubr.msk.bf16.mxu0 %vm576_vm0, %v1883_v52  ;;  %1660 = vmatprep.mubr.msk.bf16.mxu1 %vm576_vm0, %v1885_v53 }
  0x71   :  { %785 = vmatmul.mubr.bf16.gmra.mrb[36].mxu0 %v1887_v54  ;;  %913 = vmatmul.mubr.bf16.gmra.mrb[36].mxu1 %v1888_v55 }
  0x72   :  { %1645 = vmatprep.mubr.msk.bf16.mxu0 %vm576_vm0, %v1889_v56  ;;  %1661 = vmatprep.mubr.msk.bf16.mxu1 %vm576_vm0, %v1891_v57 }
  0x79   :  { %793 = vmatmul.mubr.bf16.gmra.mrb[40].mxu0 %v1893_v58  ;;  %921 = vmatmul.mubr.bf16.gmra.mrb[40].mxu1 %v1894_v59  ;;  %v88_v59 = vld [vmem:[#allocation2 + $0x20] sm:$0xff] }
  0x7a   :  { %1646 = vmatprep.mubr.msk.bf16.mxu0 %vm576_vm0, %v1895_v60  ;;  %1662 = vmatprep.mubr.msk.bf16.mxu1 %vm576_vm0, %v1897_v61  ;;  %v120_v60 = vld [vmem:[#allocation2 + $0x120] sm:$0xff] }
  0x81   :  { %801 = vmatmul.mubr.bf16.gmra.mrb[44].mxu0 %v1899_v62  ;;  %929 = vmatmul.mubr.bf16.gmra.mrb[44].mxu1 %v1900_v63 }
  0x82   :  { %1647 = vmatprep.mubr.msk.bf16.mxu0 %vm576_vm0, %v1901_v0  ;;  %1663 = vmatprep.mubr.msk.bf16.mxu1 %vm576_vm0, %v1903_v1  ;;  %v89_v1 = vld [vmem:[#allocation2 + $0x28] sm:$0xff] }
  0x89   :  { %809 = vmatmul.mubr.bf16.gmra.mrb[48].mxu0 %v1905_v2  ;;  %937 = vmatmul.mubr.bf16.gmra.mrb[48].mxu1 %v1906_v3  ;;  %v121_v2 = vld [vmem:[#allocation2 + $0x128] sm:$0xff] }
  0x8a   :  { %1648 = vmatprep.mubr.msk.bf16.mxu0 %vm576_vm0, %v1907_v4  ;;  %1664 = vmatprep.mubr.msk.bf16.mxu1 %vm576_vm0, %v1909_v5 }
  0x91   :  { %817 = vmatmul.mubr.bf16.gmra.mrb[52].mxu0 %v1911_v6  ;;  %945 = vmatmul.mubr.bf16.gmra.mrb[52].mxu1 %v1912_v7 }
  0x92   :  { %1649 = vmatprep.mubr.msk.bf16.mxu0 %vm576_vm0, %v1913_v8  ;;  %1665 = vmatprep.mubr.msk.bf16.mxu1 %vm576_vm0, %v1915_v9 }
  0x99   :  { %825 = vmatmul.mubr.bf16.gmra.mrb[56].mxu0 %v1917_v10  ;;  %953 = vmatmul.mubr.bf16.gmra.mrb[56].mxu1 %v1918_v11 }
  0x9a   :  { %1650 = vmatprep.mubr.msk.bf16.mxu0 %vm576_vm0, %v1919_v12  ;;  %1666 = vmatprep.mubr.msk.bf16.mxu1 %vm576_vm0, %v1921_v13 }
  0xa1   :  { %833 = vmatmul.mubr.bf16.gmra.mrb[60].mxu0 %v1923_v14  ;;  %961 = vmatmul.mubr.bf16.gmra.mrb[60].mxu1 %v1924_v15 }
  0xfc   :  { %v714_v18 = vpop.f32.mrb[0].mxu0  ;;  %v842_v19 = vpop.f32.mrb[0].mxu1 }
  0xfd   :  { %v969_v22 = vadd.f32 %v714_v18, %v84_v16  ;;  %v1001_v23 = vadd.f32 %v842_v19, %v116_v17  ;;  %v716_v24 = vpop.f32.mrb[1].mxu0  ;;  %v844_v25 = vpop.f32.mrb[1].mxu1 }
  0xfe   :  { %v717_v26 = vpop.f32.mrb[2].mxu0  ;;  %v845_v27 = vpop.f32.mrb[2].mxu1  ;;  %v122_v24 = vld [vmem:[#allocation2 + $0x130] sm:$0xff] }
  0xff   :  { %1034 = vst.msk [vmem:[#allocation2] sm:$0xff] %vm19_vm3, %v969_v22  ;;  %1066 = vst.msk [vmem:[#allocation2 + $0x100] sm:$0xff] %vm19_vm3, %v1001_v23  ;;  %v970_v28 = vadd.f32 %v717_v26, %v85_v20  ;;  %v1002_v29 = vadd.f32 %v845_v27, %v117_v21  ;;  %v719_v30 = vpop.f32.mrb[3].mxu0  ;;  %v847_v31 = vpop.f32.mrb[3].mxu1  ;;  %v90_v23 = vld [vmem:[#allocation2 + $0x30] sm:$0xff] }
 0x100   :  { %v123_v30 = vld [vmem:[#allocation2 + $0x138] sm:$0xff] }
 0x101   :  { %1035 = vst.msk [vmem:[#allocation2 + $0x8] sm:$0xff] %vm19_vm3, %v970_v28  ;;  %1067 = vst.msk [vmem:[#allocation2 + $0x108] sm:$0xff] %vm19_vm3, %v1002_v29  ;;  %v91_v29 = vld [vmem:[#allocation2 + $0x38] sm:$0xff] }
 0x104   :  { %v722_v35 = vpop.f32.mrb[4].mxu0  ;;  %v850_v36 = vpop.f32.mrb[4].mxu1 }
 0x105   :  { %v971_v39 = vadd.f32 %v722_v35, %v86_v32  ;;  %v1003_v40 = vadd.f32 %v850_v36, %v118_v33  ;;  %v724_v41 = vpop.f32.mrb[5].mxu0  ;;  %v852_v42 = vpop.f32.mrb[5].mxu1 }
 0x106   :  { %v1101_v43 = vld [vmem:[#allocation2] sm:$0xff]  ;;  %v725_v45 = vpop.f32.mrb[6].mxu0  ;;  %v853_v46 = vpop.f32.mrb[6].mxu1 }
 0x107   :  { %v1133_v44 = vld [vmem:[#allocation2 + $0x100] sm:$0xff]  ;;  %v1172_v47 = vadd.f32 %v2342_v34, %v1101_v43  ;;  %1036 = vst.msk [vmem:[#allocation2 + $0x10] sm:$0xff] %vm19_vm3, %v971_v39  ;;  %1068 = vst.msk [vmem:[#allocation2 + $0x110] sm:$0xff] %vm19_vm3, %v1003_v40  ;;  %v972_v49 = vadd.f32 %v725_v45, %v87_v37  ;;  %v1004_v50 = vadd.f32 %v853_v46, %v119_v38  ;;  %v727_v51 = vpop.f32.mrb[7].mxu0  ;;  %v855_v52 = vpop.f32.mrb[7].mxu1 }
 0x108   :  { %v1204_v48 = vadd.f32 %v2342_v34, %v1133_v44  ;;  %v1102_v53 = vld [vmem:[#allocation2 + $0x8] sm:$0xff]  ;;  %v92_v52 = vld [vmem:[#allocation2 + $0x40] sm:$0xff] }
 0x109   :  { %v1134_v54 = vld [vmem:[#allocation2 + $0x108] sm:$0xff]  ;;  %v1732_v55 = vpack.c.bf16 %v1172_v47, %v1172_v47  ;;  %v1173_v57 = vadd.f32 %v2342_v34, %v1102_v53  ;;  %1037 = vst.msk [vmem:[#allocation2 + $0x18] sm:$0xff] %vm19_vm3, %v972_v49  ;;  %1069 = vst.msk [vmem:[#allocation2 + $0x118] sm:$0xff] %vm19_vm3, %v1004_v50  ;;  %v124_v53 = vld [vmem:[#allocation2 + $0x140] sm:$0xff] }
 0x10a   :  { %v1764_v56 = vpack.c.bf16 %v1204_v48, %v1204_v48  ;;  %v1205_v58 = vadd.f32 %v2342_v34, %v1134_v54 }
 0x10b   :  { %1493 = vst.msk [vmem:[%s2722_s3] sm:$0xf] %vm1492_vm4, %v1732_v55  ;;  %v1733_v61 = vpack.c.bf16 %v1173_v57, %v1173_v57 }
 0x10c   :  { %1525 = vst.msk [vmem:[%s2722_s3 + $0x80] sm:$0xf] %vm1492_vm4, %v1764_v56  ;;  %v1765_v62 = vpack.c.bf16 %v1205_v58, %v1205_v58  ;;  %v730_v63 = vpop.f32.mrb[8].mxu0  ;;  %v858_v0 = vpop.f32.mrb[8].mxu1  ;;  %v93_v58 = vld [vmem:[#allocation2 + $0x48] sm:$0xff] }
 0x10d   :  { %1494 = vst.msk [vmem:[%s2722_s3 + $0x4] sm:$0xf] %vm1492_vm4, %v1733_v61  ;;  %v973_v3 = vadd.f32 %v730_v63, %v88_v59  ;;  %v1005_v4 = vadd.f32 %v858_v0, %v120_v60  ;;  %v732_v5 = vpop.f32.mrb[9].mxu0  ;;  %v860_v6 = vpop.f32.mrb[9].mxu1  ;;  %v125_v59 = vld [vmem:[#allocation2 + $0x148] sm:$0xff] }
 0x10e   :  { %1526 = vst.msk [vmem:[%s2722_s3 + $0x84] sm:$0xf] %vm1492_vm4, %v1765_v62  ;;  %v1103_v7 = vld [vmem:[#allocation2 + $0x10] sm:$0xff]  ;;  %v733_v9 = vpop.f32.mrb[10].mxu0  ;;  %v861_v10 = vpop.f32.mrb[10].mxu1 }
 0x10f   :  { %v1135_v8 = vld [vmem:[#allocation2 + $0x110] sm:$0xff]  ;;  %v1174_v11 = vadd.f32 %v2342_v34, %v1103_v7  ;;  %1038 = vst.msk [vmem:[#allocation2 + $0x20] sm:$0xff] %vm19_vm3, %v973_v3  ;;  %1070 = vst.msk [vmem:[#allocation2 + $0x120] sm:$0xff] %vm19_vm3, %v1005_v4  ;;  %v974_v13 = vadd.f32 %v733_v9, %v89_v1  ;;  %v1006_v14 = vadd.f32 %v861_v10, %v121_v2  ;;  %v735_v15 = vpop.f32.mrb[11].mxu0  ;;  %v863_v16 = vpop.f32.mrb[11].mxu1 }
 0x110   :  { %v1206_v12 = vadd.f32 %v2342_v34, %v1135_v8  ;;  %v1104_v17 = vld [vmem:[#allocation2 + $0x18] sm:$0xff]  ;;  %v94_v16 = vld [vmem:[#allocation2 + $0x50] sm:$0xff] }
 0x111   :  { %v1136_v18 = vld [vmem:[#allocation2 + $0x118] sm:$0xff]  ;;  %v1734_v19 = vpack.c.bf16 %v1174_v11, %v1174_v11  ;;  %v1175_v21 = vadd.f32 %v2342_v34, %v1104_v17  ;;  %1039 = vst.msk [vmem:[#allocation2 + $0x28] sm:$0xff] %vm19_vm3, %v974_v13  ;;  %1071 = vst.msk [vmem:[#allocation2 + $0x128] sm:$0xff] %vm19_vm3, %v1006_v14  ;;  %v126_v17 = vld [vmem:[#allocation2 + $0x150] sm:$0xff] }
 0x112   :  { %v1766_v20 = vpack.c.bf16 %v1206_v12, %v1206_v12  ;;  %v1207_v22 = vadd.f32 %v2342_v34, %v1136_v18 }
 0x113   :  { %1495 = vst.msk [vmem:[%s2722_s3 + $0x8] sm:$0xf] %vm1492_vm4, %v1734_v19  ;;  %v1735_v25 = vpack.c.bf16 %v1175_v21, %v1175_v21 }
 0x114   :  { %1527 = vst.msk [vmem:[%s2722_s3 + $0x88] sm:$0xf] %vm1492_vm4, %v1766_v20  ;;  %v1767_v26 = vpack.c.bf16 %v1207_v22, %v1207_v22  ;;  %v738_v27 = vpop.f32.mrb[12].mxu0  ;;  %v866_v28 = vpop.f32.mrb[12].mxu1  ;;  %v95_v22 = vld [vmem:[#allocation2 + $0x58] sm:$0xff] }
 0x115   :  { %1496 = vst.msk [vmem:[%s2722_s3 + $0xc] sm:$0xf] %vm1492_vm4, %v1735_v25  ;;  %v975_v31 = vadd.f32 %v738_v27, %v90_v23  ;;  %v1007_v32 = vadd.f32 %v866_v28, %v122_v24  ;;  %v740_v33 = vpop.f32.mrb[13].mxu0  ;;  %v868_v35 = vpop.f32.mrb[13].mxu1  ;;  %v127_v23 = vld [vmem:[#allocation2 + $0x158] sm:$0xff] }
 0x116   :  { %1528 = vst.msk [vmem:[%s2722_s3 + $0x8c] sm:$0xf] %vm1492_vm4, %v1767_v26  ;;  %v1105_v36 = vld [vmem:[#allocation2 + $0x20] sm:$0xff]  ;;  %v741_v38 = vpop.f32.mrb[14].mxu0  ;;  %v869_v39 = vpop.f32.mrb[14].mxu1 }
 0x117   :  { %v1137_v37 = vld [vmem:[#allocation2 + $0x120] sm:$0xff]  ;;  %v1176_v40 = vadd.f32 %v2342_v34, %v1105_v36  ;;  %1040 = vst.msk [vmem:[#allocation2 + $0x30] sm:$0xff] %vm19_vm3, %v975_v31  ;;  %1072 = vst.msk [vmem:[#allocation2 + $0x130] sm:$0xff] %vm19_vm3, %v1007_v32  ;;  %v976_v42 = vadd.f32 %v741_v38, %v91_v29  ;;  %v1008_v43 = vadd.f32 %v869_v39, %v123_v30  ;;  %v743_v44 = vpop.f32.mrb[15].mxu0  ;;  %v871_v45 = vpop.f32.mrb[15].mxu1 }
 0x118   :  { %v1208_v41 = vadd.f32 %v2342_v34, %v1137_v37  ;;  %v1106_v46 = vld [vmem:[#allocation2 + $0x28] sm:$0xff]  ;;  %v96_v45 = vld [vmem:[#allocation2 + $0x60] sm:$0xff] }
 0x119   :  { %v1138_v47 = vld [vmem:[#allocation2 + $0x128] sm:$0xff]  ;;  %v1736_v48 = vpack.c.bf16 %v1176_v40, %v1176_v40  ;;  %v1177_v50 = vadd.f32 %v2342_v34, %v1106_v46  ;;  %1041 = vst.msk [vmem:[#allocation2 + $0x38] sm:$0xff] %vm19_vm3, %v976_v42  ;;  %1073 = vst.msk [vmem:[#allocation2 + $0x138] sm:$0xff] %vm19_vm3, %v1008_v43  ;;  %v128_v46 = vld [vmem:[#allocation2 + $0x160] sm:$0xff] }
 0x11a   :  { %v1768_v49 = vpack.c.bf16 %v1208_v41, %v1208_v41  ;;  %v1209_v51 = vadd.f32 %v2342_v34, %v1138_v47 }
 0x11b   :  { %1497 = vst.msk [vmem:[%s2722_s3 + $0x10] sm:$0xf] %vm1492_vm4, %v1736_v48  ;;  %v1737_v54 = vpack.c.bf16 %v1177_v50, %v1177_v50 }
 0x11c   :  { %1529 = vst.msk [vmem:[%s2722_s3 + $0x90] sm:$0xf] %vm1492_vm4, %v1768_v49  ;;  %v1769_v55 = vpack.c.bf16 %v1209_v51, %v1209_v51  ;;  %v746_v56 = vpop.f32.mrb[16].mxu0  ;;  %v874_v57 = vpop.f32.mrb[16].mxu1  ;;  %v97_v51 = vld [vmem:[#allocation2 + $0x68] sm:$0xff] }
 0x11d   :  { %1498 = vst.msk [vmem:[%s2722_s3 + $0x14] sm:$0xf] %vm1492_vm4, %v1737_v54  ;;  %v977_v60 = vadd.f32 %v746_v56, %v92_v52  ;;  %v1009_v61 = vadd.f32 %v874_v57, %v124_v53  ;;  %v748_v62 = vpop.f32.mrb[17].mxu0  ;;  %v876_v63 = vpop.f32.mrb[17].mxu1  ;;  %v129_v52 = vld [vmem:[#allocation2 + $0x168] sm:$0xff] }
 0x11e   :  { %1530 = vst.msk [vmem:[%s2722_s3 + $0x94] sm:$0xf] %vm1492_vm4, %v1769_v55  ;;  %v1107_v0 = vld [vmem:[#allocation2 + $0x30] sm:$0xff]  ;;  %v749_v2 = vpop.f32.mrb[18].mxu0  ;;  %v877_v3 = vpop.f32.mrb[18].mxu1 }
 0x11f   :  { %v1139_v1 = vld [vmem:[#allocation2 + $0x130] sm:$0xff]  ;;  %v1178_v4 = vadd.f32 %v2342_v34, %v1107_v0  ;;  %1042 = vst.msk [vmem:[#allocation2 + $0x40] sm:$0xff] %vm19_vm3, %v977_v60  ;;  %1074 = vst.msk [vmem:[#allocation2 + $0x140] sm:$0xff] %vm19_vm3, %v1009_v61  ;;  %v978_v6 = vadd.f32 %v749_v2, %v93_v58  ;;  %v1010_v7 = vadd.f32 %v877_v3, %v125_v59  ;;  %v751_v8 = vpop.f32.mrb[19].mxu0  ;;  %v879_v9 = vpop.f32.mrb[19].mxu1 }
 0x120   :  { %v1210_v5 = vadd.f32 %v2342_v34, %v1139_v1  ;;  %v1108_v10 = vld [vmem:[#allocation2 + $0x38] sm:$0xff]  ;;  %v98_v9 = vld [vmem:[#allocation2 + $0x70] sm:$0xff] }
 0x121   :  { %v1140_v11 = vld [vmem:[#allocation2 + $0x138] sm:$0xff]  ;;  %v1738_v12 = vpack.c.bf16 %v1178_v4, %v1178_v4  ;;  %v1179_v14 = vadd.f32 %v2342_v34, %v1108_v10  ;;  %1043 = vst.msk [vmem:[#allocation2 + $0x48] sm:$0xff] %vm19_vm3, %v978_v6  ;;  %1075 = vst.msk [vmem:[#allocation2 + $0x148] sm:$0xff] %vm19_vm3, %v1010_v7  ;;  %v130_v10 = vld [vmem:[#allocation2 + $0x170] sm:$0xff] }
 0x122   :  { %v1770_v13 = vpack.c.bf16 %v1210_v5, %v1210_v5  ;;  %v1211_v15 = vadd.f32 %v2342_v34, %v1140_v11 }
 0x123   :  { %1499 = vst.msk [vmem:[%s2722_s3 + $0x18] sm:$0xf] %vm1492_vm4, %v1738_v12  ;;  %v1739_v18 = vpack.c.bf16 %v1179_v14, %v1179_v14 }
 0x124   :  { %1531 = vst.msk [vmem:[%s2722_s3 + $0x98] sm:$0xf] %vm1492_vm4, %v1770_v13  ;;  %v1771_v19 = vpack.c.bf16 %v1211_v15, %v1211_v15  ;;  %v754_v20 = vpop.f32.mrb[20].mxu0  ;;  %v882_v21 = vpop.f32.mrb[20].mxu1  ;;  %v99_v15 = vld [vmem:[#allocation2 + $0x78] sm:$0xff] }
 0x125   :  { %1500 = vst.msk [vmem:[%s2722_s3 + $0x1c] sm:$0xf] %vm1492_vm4, %v1739_v18  ;;  %v979_v24 = vadd.f32 %v754_v20, %v94_v16  ;;  %v1011_v25 = vadd.f32 %v882_v21, %v126_v17  ;;  %v756_v26 = vpop.f32.mrb[21].mxu0  ;;  %v884_v27 = vpop.f32.mrb[21].mxu1  ;;  %v131_v16 = vld [vmem:[#allocation2 + $0x178] sm:$0xff] }
 0x126   :  { %1532 = vst.msk [vmem:[%s2722_s3 + $0x9c] sm:$0xf] %vm1492_vm4, %v1771_v19  ;;  %v1109_v28 = vld [vmem:[#allocation2 + $0x40] sm:$0xff]  ;;  %v757_v30 = vpop.f32.mrb[22].mxu0  ;;  %v885_v31 = vpop.f32.mrb[22].mxu1 }
 0x127   :  { %v1141_v29 = vld [vmem:[#allocation2 + $0x140] sm:$0xff]  ;;  %v1180_v32 = vadd.f32 %v2342_v34, %v1109_v28  ;;  %1044 = vst.msk [vmem:[#allocation2 + $0x50] sm:$0xff] %vm19_vm3, %v979_v24  ;;  %1076 = vst.msk [vmem:[#allocation2 + $0x150] sm:$0xff] %vm19_vm3, %v1011_v25  ;;  %v980_v35 = vadd.f32 %v757_v30, %v95_v22  ;;  %v1012_v36 = vadd.f32 %v885_v31, %v127_v23  ;;  %v759_v37 = vpop.f32.mrb[23].mxu0  ;;  %v887_v38 = vpop.f32.mrb[23].mxu1 }
 0x128   :  { %v1212_v33 = vadd.f32 %v2342_v34, %v1141_v29  ;;  %v1110_v39 = vld [vmem:[#allocation2 + $0x48] sm:$0xff]  ;;  %v100_v38 = vld [vmem:[#allocation2 + $0x80] sm:$0xff] }
 0x129   :  { %v1142_v40 = vld [vmem:[#allocation2 + $0x148] sm:$0xff]  ;;  %v1740_v41 = vpack.c.bf16 %v1180_v32, %v1180_v32  ;;  %v1181_v43 = vadd.f32 %v2342_v34, %v1110_v39  ;;  %1045 = vst.msk [vmem:[#allocation2 + $0x58] sm:$0xff] %vm19_vm3, %v980_v35  ;;  %1077 = vst.msk [vmem:[#allocation2 + $0x158] sm:$0xff] %vm19_vm3, %v1012_v36  ;;  %v132_v39 = vld [vmem:[#allocation2 + $0x180] sm:$0xff] }
 0x12a   :  { %v1772_v42 = vpack.c.bf16 %v1212_v33, %v1212_v33  ;;  %v1213_v44 = vadd.f32 %v2342_v34, %v1142_v40 }
 0x12b   :  { %1501 = vst.msk [vmem:[%s2722_s3 + $0x20] sm:$0xf] %vm1492_vm4, %v1740_v41  ;;  %v1741_v47 = vpack.c.bf16 %v1181_v43, %v1181_v43 }
 0x12c   :  { %1533 = vst.msk [vmem:[%s2722_s3 + $0xa0] sm:$0xf] %vm1492_vm4, %v1772_v42  ;;  %v1773_v48 = vpack.c.bf16 %v1213_v44, %v1213_v44  ;;  %v762_v49 = vpop.f32.mrb[24].mxu0  ;;  %v890_v50 = vpop.f32.mrb[24].mxu1  ;;  %v101_v44 = vld [vmem:[#allocation2 + $0x88] sm:$0xff] }
 0x12d   :  { %1502 = vst.msk [vmem:[%s2722_s3 + $0x24] sm:$0xf] %vm1492_vm4, %v1741_v47  ;;  %v981_v53 = vadd.f32 %v762_v49, %v96_v45  ;;  %v1013_v54 = vadd.f32 %v890_v50, %v128_v46  ;;  %v764_v55 = vpop.f32.mrb[25].mxu0  ;;  %v892_v56 = vpop.f32.mrb[25].mxu1  ;;  %v133_v45 = vld [vmem:[#allocation2 + $0x188] sm:$0xff] }
 0x12e   :  { %1534 = vst.msk [vmem:[%s2722_s3 + $0xa4] sm:$0xf] %vm1492_vm4, %v1773_v48  ;;  %v1111_v57 = vld [vmem:[#allocation2 + $0x50] sm:$0xff]  ;;  %v765_v59 = vpop.f32.mrb[26].mxu0  ;;  %v893_v60 = vpop.f32.mrb[26].mxu1 }
 0x12f   :  { %v1143_v58 = vld [vmem:[#allocation2 + $0x150] sm:$0xff]  ;;  %v1182_v61 = vadd.f32 %v2342_v34, %v1111_v57  ;;  %1046 = vst.msk [vmem:[#allocation2 + $0x60] sm:$0xff] %vm19_vm3, %v981_v53  ;;  %1078 = vst.msk [vmem:[#allocation2 + $0x160] sm:$0xff] %vm19_vm3, %v1013_v54  ;;  %v982_v63 = vadd.f32 %v765_v59, %v97_v51  ;;  %v1014_v0 = vadd.f32 %v893_v60, %v129_v52  ;;  %v767_v1 = vpop.f32.mrb[27].mxu0  ;;  %v895_v2 = vpop.f32.mrb[27].mxu1 }
 0x130   :  { %v1214_v62 = vadd.f32 %v2342_v34, %v1143_v58  ;;  %v1112_v3 = vld [vmem:[#allocation2 + $0x58] sm:$0xff]  ;;  %v102_v2 = vld [vmem:[#allocation2 + $0x90] sm:$0xff] }
 0x131   :  { %v1144_v4 = vld [vmem:[#allocation2 + $0x158] sm:$0xff]  ;;  %v1742_v5 = vpack.c.bf16 %v1182_v61, %v1182_v61  ;;  %v1183_v7 = vadd.f32 %v2342_v34, %v1112_v3  ;;  %1047 = vst.msk [vmem:[#allocation2 + $0x68] sm:$0xff] %vm19_vm3, %v982_v63  ;;  %1079 = vst.msk [vmem:[#allocation2 + $0x168] sm:$0xff] %vm19_vm3, %v1014_v0  ;;  %v134_v3 = vld [vmem:[#allocation2 + $0x190] sm:$0xff] }
 0x132   :  { %v1774_v6 = vpack.c.bf16 %v1214_v62, %v1214_v62  ;;  %v1215_v8 = vadd.f32 %v2342_v34, %v1144_v4 }
 0x133   :  { %1503 = vst.msk [vmem:[%s2722_s3 + $0x28] sm:$0xf] %vm1492_vm4, %v1742_v5  ;;  %v1743_v11 = vpack.c.bf16 %v1183_v7, %v1183_v7 }
 0x134   :  { %1535 = vst.msk [vmem:[%s2722_s3 + $0xa8] sm:$0xf] %vm1492_vm4, %v1774_v6  ;;  %v1775_v12 = vpack.c.bf16 %v1215_v8, %v1215_v8  ;;  %v770_v13 = vpop.f32.mrb[28].mxu0  ;;  %v898_v14 = vpop.f32.mrb[28].mxu1  ;;  %v103_v8 = vld [vmem:[#allocation2 + $0x98] sm:$0xff] }
 0x135   :  { %1504 = vst.msk [vmem:[%s2722_s3 + $0x2c] sm:$0xf] %vm1492_vm4, %v1743_v11  ;;  %v983_v17 = vadd.f32 %v770_v13, %v98_v9  ;;  %v1015_v18 = vadd.f32 %v898_v14, %v130_v10  ;;  %v772_v19 = vpop.f32.mrb[29].mxu0  ;;  %v900_v20 = vpop.f32.mrb[29].mxu1  ;;  %v135_v9 = vld [vmem:[#allocation2 + $0x198] sm:$0xff] }
 0x136   :  { %1536 = vst.msk [vmem:[%s2722_s3 + $0xac] sm:$0xf] %vm1492_vm4, %v1775_v12  ;;  %v1113_v21 = vld [vmem:[#allocation2 + $0x60] sm:$0xff]  ;;  %v773_v23 = vpop.f32.mrb[30].mxu0  ;;  %v901_v24 = vpop.f32.mrb[30].mxu1 }
 0x137   :  { %v1145_v22 = vld [vmem:[#allocation2 + $0x160] sm:$0xff]  ;;  %v1184_v25 = vadd.f32 %v2342_v34, %v1113_v21  ;;  %1048 = vst.msk [vmem:[#allocation2 + $0x70] sm:$0xff] %vm19_vm3, %v983_v17  ;;  %1080 = vst.msk [vmem:[#allocation2 + $0x170] sm:$0xff] %vm19_vm3, %v1015_v18  ;;  %v984_v27 = vadd.f32 %v773_v23, %v99_v15  ;;  %v1016_v28 = vadd.f32 %v901_v24, %v131_v16  ;;  %v775_v29 = vpop.f32.mrb[31].mxu0  ;;  %v903_v30 = vpop.f32.mrb[31].mxu1 }
 0x138   :  { %v1216_v26 = vadd.f32 %v2342_v34, %v1145_v22  ;;  %v1114_v31 = vld [vmem:[#allocation2 + $0x68] sm:$0xff]  ;;  %v104_v30 = vld [vmem:[#allocation2 + $0xa0] sm:$0xff] }
 0x139   :  { %v1146_v32 = vld [vmem:[#allocation2 + $0x168] sm:$0xff]  ;;  %v1744_v33 = vpack.c.bf16 %v1184_v25, %v1184_v25  ;;  %v1185_v36 = vadd.f32 %v2342_v34, %v1114_v31  ;;  %1049 = vst.msk [vmem:[#allocation2 + $0x78] sm:$0xff] %vm19_vm3, %v984_v27  ;;  %1081 = vst.msk [vmem:[#allocation2 + $0x178] sm:$0xff] %vm19_vm3, %v1016_v28  ;;  %v136_v31 = vld [vmem:[#allocation2 + $0x1a0] sm:$0xff] }
 0x13a   :  { %v1776_v35 = vpack.c.bf16 %v1216_v26, %v1216_v26  ;;  %v1217_v37 = vadd.f32 %v2342_v34, %v1146_v32 }
 0x13b   :  { %1505 = vst.msk [vmem:[%s2722_s3 + $0x30] sm:$0xf] %vm1492_vm4, %v1744_v33  ;;  %v1745_v40 = vpack.c.bf16 %v1185_v36, %v1185_v36 }
 0x13c   :  { %1537 = vst.msk [vmem:[%s2722_s3 + $0xb0] sm:$0xf] %vm1492_vm4, %v1776_v35  ;;  %v1777_v41 = vpack.c.bf16 %v1217_v37, %v1217_v37  ;;  %v778_v42 = vpop.f32.mrb[32].mxu0  ;;  %v906_v43 = vpop.f32.mrb[32].mxu1  ;;  %v105_v37 = vld [vmem:[#allocation2 + $0xa8] sm:$0xff] }
 0x13d   :  { %1506 = vst.msk [vmem:[%s2722_s3 + $0x34] sm:$0xf] %vm1492_vm4, %v1745_v40  ;;  %v985_v46 = vadd.f32 %v778_v42, %v100_v38  ;;  %v1017_v47 = vadd.f32 %v906_v43, %v132_v39  ;;  %v780_v48 = vpop.f32.mrb[33].mxu0  ;;  %v908_v49 = vpop.f32.mrb[33].mxu1  ;;  %v137_v38 = vld [vmem:[#allocation2 + $0x1a8] sm:$0xff] }
 0x13e   :  { %1538 = vst.msk [vmem:[%s2722_s3 + $0xb4] sm:$0xf] %vm1492_vm4, %v1777_v41  ;;  %v1115_v50 = vld [vmem:[#allocation2 + $0x70] sm:$0xff]  ;;  %v781_v52 = vpop.f32.mrb[34].mxu0  ;;  %v909_v53 = vpop.f32.mrb[34].mxu1 }
 0x13f   :  { %v1147_v51 = vld [vmem:[#allocation2 + $0x170] sm:$0xff]  ;;  %v1186_v54 = vadd.f32 %v2342_v34, %v1115_v50  ;;  %1050 = vst.msk [vmem:[#allocation2 + $0x80] sm:$0xff] %vm19_vm3, %v985_v46  ;;  %1082 = vst.msk [vmem:[#allocation2 + $0x180] sm:$0xff] %vm19_vm3, %v1017_v47  ;;  %v986_v56 = vadd.f32 %v781_v52, %v101_v44  ;;  %v1018_v57 = vadd.f32 %v909_v53, %v133_v45  ;;  %v783_v58 = vpop.f32.mrb[35].mxu0  ;;  %v911_v59 = vpop.f32.mrb[35].mxu1 }
 0x140   :  { %v1218_v55 = vadd.f32 %v2342_v34, %v1147_v51  ;;  %v1116_v60 = vld [vmem:[#allocation2 + $0x78] sm:$0xff]  ;;  %v106_v59 = vld [vmem:[#allocation2 + $0xb0] sm:$0xff] }
 0x141   :  { %v1148_v61 = vld [vmem:[#allocation2 + $0x178] sm:$0xff]  ;;  %v1746_v62 = vpack.c.bf16 %v1186_v54, %v1186_v54  ;;  %v1187_v0 = vadd.f32 %v2342_v34, %v1116_v60  ;;  %1051 = vst.msk [vmem:[#allocation2 + $0x88] sm:$0xff] %vm19_vm3, %v986_v56  ;;  %1083 = vst.msk [vmem:[#allocation2 + $0x188] sm:$0xff] %vm19_vm3, %v1018_v57  ;;  %v138_v60 = vld [vmem:[#allocation2 + $0x1b0] sm:$0xff] }
 0x142   :  { %v1778_v63 = vpack.c.bf16 %v1218_v55, %v1218_v55  ;;  %v1219_v1 = vadd.f32 %v2342_v34, %v1148_v61 }
 0x143   :  { %1507 = vst.msk [vmem:[%s2722_s3 + $0x38] sm:$0xf] %vm1492_vm4, %v1746_v62  ;;  %v1747_v4 = vpack.c.bf16 %v1187_v0, %v1187_v0 }
 0x144   :  { %1539 = vst.msk [vmem:[%s2722_s3 + $0xb8] sm:$0xf] %vm1492_vm4, %v1778_v63  ;;  %v1779_v5 = vpack.c.bf16 %v1219_v1, %v1219_v1  ;;  %v786_v6 = vpop.f32.mrb[36].mxu0  ;;  %v914_v7 = vpop.f32.mrb[36].mxu1  ;;  %v107_v1 = vld [vmem:[#allocation2 + $0xb8] sm:$0xff] }
 0x145   :  { %1508 = vst.msk [vmem:[%s2722_s3 + $0x3c] sm:$0xf] %vm1492_vm4, %v1747_v4  ;;  %v987_v10 = vadd.f32 %v786_v6, %v102_v2  ;;  %v1019_v11 = vadd.f32 %v914_v7, %v134_v3  ;;  %v788_v12 = vpop.f32.mrb[37].mxu0  ;;  %v916_v13 = vpop.f32.mrb[37].mxu1  ;;  %v139_v2 = vld [vmem:[#allocation2 + $0x1b8] sm:$0xff] }
 0x146   :  { %1540 = vst.msk [vmem:[%s2722_s3 + $0xbc] sm:$0xf] %vm1492_vm4, %v1779_v5  ;;  %v1117_v14 = vld [vmem:[#allocation2 + $0x80] sm:$0xff]  ;;  %v789_v16 = vpop.f32.mrb[38].mxu0  ;;  %v917_v17 = vpop.f32.mrb[38].mxu1 }
 0x147   :  { %v1149_v15 = vld [vmem:[#allocation2 + $0x180] sm:$0xff]  ;;  %v1188_v18 = vadd.f32 %v2342_v34, %v1117_v14  ;;  %1052 = vst.msk [vmem:[#allocation2 + $0x90] sm:$0xff] %vm19_vm3, %v987_v10  ;;  %1084 = vst.msk [vmem:[#allocation2 + $0x190] sm:$0xff] %vm19_vm3, %v1019_v11  ;;  %v988_v20 = vadd.f32 %v789_v16, %v103_v8  ;;  %v1020_v21 = vadd.f32 %v917_v17, %v135_v9  ;;  %v791_v22 = vpop.f32.mrb[39].mxu0  ;;  %v919_v23 = vpop.f32.mrb[39].mxu1 }
 0x148   :  { %v1220_v19 = vadd.f32 %v2342_v34, %v1149_v15  ;;  %v1118_v24 = vld [vmem:[#allocation2 + $0x88] sm:$0xff]  ;;  %v108_v23 = vld [vmem:[#allocation2 + $0xc0] sm:$0xff] }
 0x149   :  { %v1150_v25 = vld [vmem:[#allocation2 + $0x188] sm:$0xff]  ;;  %v1748_v26 = vpack.c.bf16 %v1188_v18, %v1188_v18  ;;  %v1189_v28 = vadd.f32 %v2342_v34, %v1118_v24  ;;  %1053 = vst.msk [vmem:[#allocation2 + $0x98] sm:$0xff] %vm19_vm3, %v988_v20  ;;  %1085 = vst.msk [vmem:[#allocation2 + $0x198] sm:$0xff] %vm19_vm3, %v1020_v21  ;;  %v140_v24 = vld [vmem:[#allocation2 + $0x1c0] sm:$0xff] }
 0x14a   :  { %v1780_v27 = vpack.c.bf16 %v1220_v19, %v1220_v19  ;;  %v1221_v29 = vadd.f32 %v2342_v34, %v1150_v25 }
 0x14b   :  { %1509 = vst.msk [vmem:[%s2722_s3 + $0x40] sm:$0xf] %vm1492_vm4, %v1748_v26  ;;  %v1749_v32 = vpack.c.bf16 %v1189_v28, %v1189_v28 }
 0x14c   :  { %1541 = vst.msk [vmem:[%s2722_s3 + $0xc0] sm:$0xf] %vm1492_vm4, %v1780_v27  ;;  %v1781_v33 = vpack.c.bf16 %v1221_v29, %v1221_v29  ;;  %v794_v35 = vpop.f32.mrb[40].mxu0  ;;  %v922_v36 = vpop.f32.mrb[40].mxu1  ;;  %v109_v29 = vld [vmem:[#allocation2 + $0xc8] sm:$0xff] }
 0x14d   :  { %1510 = vst.msk [vmem:[%s2722_s3 + $0x44] sm:$0xf] %vm1492_vm4, %v1749_v32  ;;  %v989_v39 = vadd.f32 %v794_v35, %v104_v30  ;;  %v1021_v40 = vadd.f32 %v922_v36, %v136_v31  ;;  %v796_v41 = vpop.f32.mrb[41].mxu0  ;;  %v924_v42 = vpop.f32.mrb[41].mxu1  ;;  %v141_v30 = vld [vmem:[#allocation2 + $0x1c8] sm:$0xff] }
 0x14e   :  { %1542 = vst.msk [vmem:[%s2722_s3 + $0xc4] sm:$0xf] %vm1492_vm4, %v1781_v33  ;;  %v1119_v43 = vld [vmem:[#allocation2 + $0x90] sm:$0xff]  ;;  %v797_v45 = vpop.f32.mrb[42].mxu0  ;;  %v925_v46 = vpop.f32.mrb[42].mxu1 }
 0x14f   :  { %v1151_v44 = vld [vmem:[#allocation2 + $0x190] sm:$0xff]  ;;  %v1190_v47 = vadd.f32 %v2342_v34, %v1119_v43  ;;  %1054 = vst.msk [vmem:[#allocation2 + $0xa0] sm:$0xff] %vm19_vm3, %v989_v39  ;;  %1086 = vst.msk [vmem:[#allocation2 + $0x1a0] sm:$0xff] %vm19_vm3, %v1021_v40  ;;  %v990_v49 = vadd.f32 %v797_v45, %v105_v37  ;;  %v1022_v50 = vadd.f32 %v925_v46, %v137_v38  ;;  %v799_v51 = vpop.f32.mrb[43].mxu0  ;;  %v927_v52 = vpop.f32.mrb[43].mxu1 }
 0x150   :  { %v1222_v48 = vadd.f32 %v2342_v34, %v1151_v44  ;;  %v1120_v53 = vld [vmem:[#allocation2 + $0x98] sm:$0xff]  ;;  %v110_v52 = vld [vmem:[#allocation2 + $0xd0] sm:$0xff] }
 0x151   :  { %v1152_v54 = vld [vmem:[#allocation2 + $0x198] sm:$0xff]  ;;  %v1750_v55 = vpack.c.bf16 %v1190_v47, %v1190_v47  ;;  %v1191_v57 = vadd.f32 %v2342_v34, %v1120_v53  ;;  %1055 = vst.msk [vmem:[#allocation2 + $0xa8] sm:$0xff] %vm19_vm3, %v990_v49  ;;  %1087 = vst.msk [vmem:[#allocation2 + $0x1a8] sm:$0xff] %vm19_vm3, %v1022_v50  ;;  %v142_v53 = vld [vmem:[#allocation2 + $0x1d0] sm:$0xff] }
 0x152   :  { %v1782_v56 = vpack.c.bf16 %v1222_v48, %v1222_v48  ;;  %v1223_v58 = vadd.f32 %v2342_v34, %v1152_v54 }
 0x153   :  { %1511 = vst.msk [vmem:[%s2722_s3 + $0x48] sm:$0xf] %vm1492_vm4, %v1750_v55  ;;  %v1751_v61 = vpack.c.bf16 %v1191_v57, %v1191_v57 }
 0x154   :  { %1543 = vst.msk [vmem:[%s2722_s3 + $0xc8] sm:$0xf] %vm1492_vm4, %v1782_v56  ;;  %v1783_v62 = vpack.c.bf16 %v1223_v58, %v1223_v58  ;;  %v802_v63 = vpop.f32.mrb[44].mxu0  ;;  %v930_v0 = vpop.f32.mrb[44].mxu1  ;;  %v111_v58 = vld [vmem:[#allocation2 + $0xd8] sm:$0xff] }
 0x155   :  { %1512 = vst.msk [vmem:[%s2722_s3 + $0x4c] sm:$0xf] %vm1492_vm4, %v1751_v61  ;;  %v991_v3 = vadd.f32 %v802_v63, %v106_v59  ;;  %v1023_v4 = vadd.f32 %v930_v0, %v138_v60  ;;  %v804_v5 = vpop.f32.mrb[45].mxu0  ;;  %v932_v6 = vpop.f32.mrb[45].mxu1  ;;  %v143_v59 = vld [vmem:[#allocation2 + $0x1d8] sm:$0xff] }
 0x156   :  { %1544 = vst.msk [vmem:[%s2722_s3 + $0xcc] sm:$0xf] %vm1492_vm4, %v1783_v62  ;;  %v1121_v7 = vld [vmem:[#allocation2 + $0xa0] sm:$0xff]  ;;  %v805_v9 = vpop.f32.mrb[46].mxu0  ;;  %v933_v10 = vpop.f32.mrb[46].mxu1 }
 0x157   :  { %v1153_v8 = vld [vmem:[#allocation2 + $0x1a0] sm:$0xff]  ;;  %v1192_v11 = vadd.f32 %v2342_v34, %v1121_v7  ;;  %1056 = vst.msk [vmem:[#allocation2 + $0xb0] sm:$0xff] %vm19_vm3, %v991_v3  ;;  %1088 = vst.msk [vmem:[#allocation2 + $0x1b0] sm:$0xff] %vm19_vm3, %v1023_v4  ;;  %v992_v13 = vadd.f32 %v805_v9, %v107_v1  ;;  %v1024_v14 = vadd.f32 %v933_v10, %v139_v2  ;;  %v807_v15 = vpop.f32.mrb[47].mxu0  ;;  %v935_v16 = vpop.f32.mrb[47].mxu1 }
 0x158   :  { %v1224_v12 = vadd.f32 %v2342_v34, %v1153_v8  ;;  %v1122_v17 = vld [vmem:[#allocation2 + $0xa8] sm:$0xff]  ;;  %v112_v16 = vld [vmem:[#allocation2 + $0xe0] sm:$0xff] }
 0x159   :  { %v1154_v18 = vld [vmem:[#allocation2 + $0x1a8] sm:$0xff]  ;;  %v1752_v19 = vpack.c.bf16 %v1192_v11, %v1192_v11  ;;  %v1193_v21 = vadd.f32 %v2342_v34, %v1122_v17  ;;  %1057 = vst.msk [vmem:[#allocation2 + $0xb8] sm:$0xff] %vm19_vm3, %v992_v13  ;;  %1089 = vst.msk [vmem:[#allocation2 + $0x1b8] sm:$0xff] %vm19_vm3, %v1024_v14  ;;  %v144_v17 = vld [vmem:[#allocation2 + $0x1e0] sm:$0xff] }
 0x15a   :  { %v1784_v20 = vpack.c.bf16 %v1224_v12, %v1224_v12  ;;  %v1225_v22 = vadd.f32 %v2342_v34, %v1154_v18 }
 0x15b   :  { %1513 = vst.msk [vmem:[%s2722_s3 + $0x50] sm:$0xf] %vm1492_vm4, %v1752_v19  ;;  %v1753_v25 = vpack.c.bf16 %v1193_v21, %v1193_v21 }
 0x15c   :  { %1545 = vst.msk [vmem:[%s2722_s3 + $0xd0] sm:$0xf] %vm1492_vm4, %v1784_v20  ;;  %v1785_v26 = vpack.c.bf16 %v1225_v22, %v1225_v22  ;;  %v810_v27 = vpop.f32.mrb[48].mxu0  ;;  %v938_v28 = vpop.f32.mrb[48].mxu1  ;;  %v113_v22 = vld [vmem:[#allocation2 + $0xe8] sm:$0xff] }
 0x15d   :  { %1514 = vst.msk [vmem:[%s2722_s3 + $0x54] sm:$0xf] %vm1492_vm4, %v1753_v25  ;;  %v993_v31 = vadd.f32 %v810_v27, %v108_v23  ;;  %v1025_v32 = vadd.f32 %v938_v28, %v140_v24  ;;  %v812_v33 = vpop.f32.mrb[49].mxu0  ;;  %v940_v35 = vpop.f32.mrb[49].mxu1  ;;  %v145_v23 = vld [vmem:[#allocation2 + $0x1e8] sm:$0xff] }
 0x15e   :  { %1546 = vst.msk [vmem:[%s2722_s3 + $0xd4] sm:$0xf] %vm1492_vm4, %v1785_v26  ;;  %v1123_v36 = vld [vmem:[#allocation2 + $0xb0] sm:$0xff]  ;;  %v813_v38 = vpop.f32.mrb[50].mxu0  ;;  %v941_v39 = vpop.f32.mrb[50].mxu1 }
 0x15f   :  { %v1155_v37 = vld [vmem:[#allocation2 + $0x1b0] sm:$0xff]  ;;  %v1194_v40 = vadd.f32 %v2342_v34, %v1123_v36  ;;  %1058 = vst.msk [vmem:[#allocation2 + $0xc0] sm:$0xff] %vm19_vm3, %v993_v31  ;;  %1090 = vst.msk [vmem:[#allocation2 + $0x1c0] sm:$0xff] %vm19_vm3, %v1025_v32  ;;  %v994_v42 = vadd.f32 %v813_v38, %v109_v29  ;;  %v1026_v43 = vadd.f32 %v941_v39, %v141_v30  ;;  %v815_v44 = vpop.f32.mrb[51].mxu0  ;;  %v943_v45 = vpop.f32.mrb[51].mxu1 }
 0x160   :  { %v1226_v41 = vadd.f32 %v2342_v34, %v1155_v37  ;;  %v1124_v46 = vld [vmem:[#allocation2 + $0xb8] sm:$0xff]  ;;  %v114_v45 = vld [vmem:[#allocation2 + $0xf0] sm:$0xff] }
 0x161   :  { %v1156_v47 = vld [vmem:[#allocation2 + $0x1b8] sm:$0xff]  ;;  %v1754_v48 = vpack.c.bf16 %v1194_v40, %v1194_v40  ;;  %v1195_v50 = vadd.f32 %v2342_v34, %v1124_v46  ;;  %1059 = vst.msk [vmem:[#allocation2 + $0xc8] sm:$0xff] %vm19_vm3, %v994_v42  ;;  %1091 = vst.msk [vmem:[#allocation2 + $0x1c8] sm:$0xff] %vm19_vm3, %v1026_v43  ;;  %v146_v46 = vld [vmem:[#allocation2 + $0x1f0] sm:$0xff] }
 0x162   :  { %v1786_v49 = vpack.c.bf16 %v1226_v41, %v1226_v41  ;;  %v1227_v51 = vadd.f32 %v2342_v34, %v1156_v47 }
 0x163   :  { %1515 = vst.msk [vmem:[%s2722_s3 + $0x58] sm:$0xf] %vm1492_vm4, %v1754_v48  ;;  %v1755_v54 = vpack.c.bf16 %v1195_v50, %v1195_v50  ;;  %v115_v50 = vld [vmem:[#allocation2 + $0xf8] sm:$0xff] }
 0x164   :  { %1547 = vst.msk [vmem:[%s2722_s3 + $0xd8] sm:$0xf] %vm1492_vm4, %v1786_v49  ;;  %v1787_v55 = vpack.c.bf16 %v1227_v51, %v1227_v51  ;;  %v818_v56 = vpop.f32.mrb[52].mxu0  ;;  %v946_v57 = vpop.f32.mrb[52].mxu1  ;;  %v147_v51 = vld [vmem:[#allocation2 + $0x1f8] sm:$0xff] }
 0x165   :  { %1516 = vst.msk [vmem:[%s2722_s3 + $0x5c] sm:$0xf] %vm1492_vm4, %v1755_v54  ;;  %v995_v60 = vadd.f32 %v818_v56, %v110_v52  ;;  %v1027_v61 = vadd.f32 %v946_v57, %v142_v53  ;;  %v820_v62 = vpop.f32.mrb[53].mxu0  ;;  %v948_v63 = vpop.f32.mrb[53].mxu1 }
 0x166   :  { %1548 = vst.msk [vmem:[%s2722_s3 + $0xdc] sm:$0xf] %vm1492_vm4, %v1787_v55  ;;  %v1125_v0 = vld [vmem:[#allocation2 + $0xc0] sm:$0xff]  ;;  %v821_v2 = vpop.f32.mrb[54].mxu0  ;;  %v949_v3 = vpop.f32.mrb[54].mxu1 }
 0x167   :  { %v1157_v1 = vld [vmem:[#allocation2 + $0x1c0] sm:$0xff]  ;;  %v1196_v4 = vadd.f32 %v2342_v34, %v1125_v0  ;;  %1060 = vst.msk [vmem:[#allocation2 + $0xd0] sm:$0xff] %vm19_vm3, %v995_v60  ;;  %1092 = vst.msk [vmem:[#allocation2 + $0x1d0] sm:$0xff] %vm19_vm3, %v1027_v61  ;;  %v996_v6 = vadd.f32 %v821_v2, %v111_v58  ;;  %v1028_v7 = vadd.f32 %v949_v3, %v143_v59  ;;  %v823_v8 = vpop.f32.mrb[55].mxu0  ;;  %v951_v9 = vpop.f32.mrb[55].mxu1 }
 0x168   :  { %v1228_v5 = vadd.f32 %v2342_v34, %v1157_v1  ;;  %v1126_v10 = vld [vmem:[#allocation2 + $0xc8] sm:$0xff]  ;;  %v1925_v60 = vld [vmem:[%s2721_s2] ss:$0 sm:$0xff] }
 0x169   :  { %v1158_v11 = vld [vmem:[#allocation2 + $0x1c8] sm:$0xff]  ;;  %v1756_v12 = vpack.c.bf16 %v1196_v4, %v1196_v4  ;;  %v1197_v14 = vadd.f32 %v2342_v34, %v1126_v10  ;;  %1061 = vst.msk [vmem:[#allocation2 + $0xd8] sm:$0xff] %vm19_vm3, %v996_v6  ;;  %1093 = vst.msk [vmem:[#allocation2 + $0x1d8] sm:$0xff] %vm19_vm3, %v1028_v7 }
 0x16a   :  { %v1788_v13 = vpack.c.bf16 %v1228_v5, %v1228_v5  ;;  %v1229_v15 = vadd.f32 %v2342_v34, %v1158_v11 }
 0x16b   :  { %1517 = vst.msk [vmem:[%s2722_s3 + $0x60] sm:$0xf] %vm1492_vm4, %v1756_v12  ;;  %v1757_v18 = vpack.c.bf16 %v1197_v14, %v1197_v14 }
 0x16c   :  { %1549 = vst.msk [vmem:[%s2722_s3 + $0xe0] sm:$0xf] %vm1492_vm4, %v1788_v13  ;;  %v1789_v19 = vpack.c.bf16 %v1229_v15, %v1229_v15  ;;  %v826_v20 = vpop.f32.mrb[56].mxu0  ;;  %v954_v21 = vpop.f32.mrb[56].mxu1 }
 0x16d   :  { %1518 = vst.msk [vmem:[%s2722_s3 + $0x64] sm:$0xf] %vm1492_vm4, %v1757_v18  ;;  %v997_v24 = vadd.f32 %v826_v20, %v112_v16  ;;  %v1029_v25 = vadd.f32 %v954_v21, %v144_v17  ;;  %v828_v26 = vpop.f32.mrb[57].mxu0  ;;  %v956_v27 = vpop.f32.mrb[57].mxu1 }
 0x16e   :  { %1550 = vst.msk [vmem:[%s2722_s3 + $0xe4] sm:$0xf] %vm1492_vm4, %v1789_v19  ;;  %v1127_v28 = vld [vmem:[#allocation2 + $0xd0] sm:$0xff]  ;;  %v829_v30 = vpop.f32.mrb[58].mxu0  ;;  %v957_v31 = vpop.f32.mrb[58].mxu1 }
 0x16f   :  { %v1159_v29 = vld [vmem:[#allocation2 + $0x1d0] sm:$0xff]  ;;  %v1198_v32 = vadd.f32 %v2342_v34, %v1127_v28  ;;  %1062 = vst.msk [vmem:[#allocation2 + $0xe0] sm:$0xff] %vm19_vm3, %v997_v24  ;;  %1094 = vst.msk [vmem:[#allocation2 + $0x1e0] sm:$0xff] %vm19_vm3, %v1029_v25  ;;  %v998_v35 = vadd.f32 %v829_v30, %v113_v22  ;;  %v1030_v36 = vadd.f32 %v957_v31, %v145_v23  ;;  %v831_v37 = vpop.f32.mrb[59].mxu0  ;;  %v959_v38 = vpop.f32.mrb[59].mxu1 }
 0x170   :  { %v1230_v33 = vadd.f32 %v2342_v34, %v1159_v29  ;;  %v1128_v39 = vld [vmem:[#allocation2 + $0xd8] sm:$0xff] }
 0x171   :  { %v1160_v40 = vld [vmem:[#allocation2 + $0x1d8] sm:$0xff]  ;;  %v1758_v41 = vpack.c.bf16 %v1198_v32, %v1198_v32  ;;  %v1199_v43 = vadd.f32 %v2342_v34, %v1128_v39  ;;  %1063 = vst.msk [vmem:[#allocation2 + $0xe8] sm:$0xff] %vm19_vm3, %v998_v35  ;;  %1095 = vst.msk [vmem:[#allocation2 + $0x1e8] sm:$0xff] %vm19_vm3, %v1030_v36 }
 0x172   :  { %v1790_v42 = vpack.c.bf16 %v1230_v33, %v1230_v33  ;;  %v1231_v44 = vadd.f32 %v2342_v34, %v1160_v40 }
 0x173   :  { %1519 = vst.msk [vmem:[%s2722_s3 + $0x68] sm:$0xf] %vm1492_vm4, %v1758_v41  ;;  %v1759_v47 = vpack.c.bf16 %v1199_v43, %v1199_v43 }
 0x174   :  { %1551 = vst.msk [vmem:[%s2722_s3 + $0xe8] sm:$0xf] %vm1492_vm4, %v1790_v42  ;;  %v1791_v48 = vpack.c.bf16 %v1231_v44, %v1231_v44  ;;  %v834_v49 = vpop.f32.mrb[60].mxu0  ;;  %v962_v34 = vpop.f32.mrb[60].mxu1 }
 0x175   :  { %1520 = vst.msk [vmem:[%s2722_s3 + $0x6c] sm:$0xf] %vm1492_vm4, %v1759_v47  ;;  %v999_v52 = vadd.f32 %v834_v49, %v114_v45  ;;  %v1031_v53 = vadd.f32 %v962_v34, %v146_v46  ;;  %v836_v54 = vpop.f32.mrb[61].mxu0  ;;  %v964_v55 = vpop.f32.mrb[61].mxu1 }
 0x176   :  { %1552 = vst.msk [vmem:[%s2722_s3 + $0xec] sm:$0xf] %vm1492_vm4, %v1791_v48  ;;  %v1129_v56 = vld [vmem:[#allocation2 + $0xe0] sm:$0xff]  ;;  %v837_v58 = vpop.f32.mrb[62].mxu0  ;;  %v965_v59 = vpop.f32.mrb[62].mxu1 }
 0x177   :  { %v1161_v57 = vld [vmem:[#allocation2 + $0x1e0] sm:$0xff]  ;;  %v1200_v61 = vadd.f32 %v1925_v60, %v1129_v56  ;;  %1064 = vst.msk [vmem:[#allocation2 + $0xf0] sm:$0xff] %vm19_vm3, %v999_v52  ;;  %1096 = vst.msk [vmem:[#allocation2 + $0x1f0] sm:$0xff] %vm19_vm3, %v1031_v53  ;;  %v1000_v63 = vadd.f32 %v837_v58, %v115_v50  ;;  %v1032_v0 = vadd.f32 %v965_v59, %v147_v51  ;;  %v839_v1 = vpop.f32.mrb[63].mxu0  ;;  %v967_v2 = vpop.f32.mrb[63].mxu1 }
 0x178   :  { %v1232_v62 = vadd.f32 %v1925_v60, %v1161_v57  ;;  %v1130_v3 = vld [vmem:[#allocation2 + $0xe8] sm:$0xff] }
 0x179   :  { %v1162_v4 = vld [vmem:[#allocation2 + $0x1e8] sm:$0xff]  ;;  %v1760_v5 = vpack.c.bf16 %v1200_v61, %v1200_v61  ;;  %v1201_v7 = vadd.f32 %v1925_v60, %v1130_v3  ;;  %1065 = vst.msk [vmem:[#allocation2 + $0xf8] sm:$0xff] %vm19_vm3, %v1000_v63  ;;  %1097 = vst.msk [vmem:[#allocation2 + $0x1f8] sm:$0xff] %vm19_vm3, %v1032_v0 }
 0x17a   :  { %v1792_v6 = vpack.c.bf16 %v1232_v62, %v1232_v62  ;;  %v1233_v8 = vadd.f32 %v1925_v60, %v1162_v4 }
 0x17b   :  { %1521 = vst.msk [vmem:[%s2722_s3 + $0x70] sm:$0xf] %vm1492_vm4, %v1760_v5  ;;  %v1761_v9 = vpack.c.bf16 %v1201_v7, %v1201_v7 }
 0x17c   :  { %1553 = vst.msk [vmem:[%s2722_s3 + $0xf0] sm:$0xf] %vm1492_vm4, %v1792_v6  ;;  %v1793_v10 = vpack.c.bf16 %v1233_v8, %v1233_v8 }
 0x17d   :  { %1522 = vst.msk [vmem:[%s2722_s3 + $0x74] sm:$0xf] %vm1492_vm4, %v1761_v9 }
 0x17e   :  { %1554 = vst.msk [vmem:[%s2722_s3 + $0xf4] sm:$0xf] %vm1492_vm4, %v1793_v10  ;;  %v1131_v11 = vld [vmem:[#allocation2 + $0xf0] sm:$0xff] }
 0x17f   :  { %v1163_v12 = vld [vmem:[#allocation2 + $0x1f0] sm:$0xff]  ;;  %v1202_v13 = vadd.f32 %v1925_v60, %v1131_v11 }
 0x180   :  { %v1234_v14 = vadd.f32 %v1925_v60, %v1163_v12  ;;  %v1132_v15 = vld [vmem:[#allocation2 + $0xf8] sm:$0xff] }
 0x181   :  { %v1164_v16 = vld [vmem:[#allocation2 + $0x1f8] sm:$0xff]  ;;  %v1762_v17 = vpack.c.bf16 %v1202_v13, %v1202_v13  ;;  %v1203_v19 = vadd.f32 %v1925_v60, %v1132_v15 }
 0x182   :  { %v1794_v18 = vpack.c.bf16 %v1234_v14, %v1234_v14  ;;  %v1235_v20 = vadd.f32 %v1925_v60, %v1164_v16 }
 0x183   :  { %1523 = vst.msk [vmem:[%s2722_s3 + $0x78] sm:$0xf] %vm1492_vm4, %v1762_v17  ;;  %v1763_v21 = vpack.c.bf16 %v1203_v19, %v1203_v19 }
 0x184   :  { %1555 = vst.msk [vmem:[%s2722_s3 + $0xf8] sm:$0xf] %vm1492_vm4, %v1794_v18  ;;  %v1795_v22 = vpack.c.bf16 %v1235_v20, %v1235_v20 }
 0x185   :  { %1524 = vst.msk [vmem:[%s2722_s3 + $0x7c] sm:$0xf] %vm1492_vm4, %v1763_v21 }
 0x186   :  { %1556 = vst.msk [vmem:[%s2722_s3 + $0xfc] sm:$0xf] %vm1492_vm4, %v1795_v22 }

</bundles_post_ra>
